<compile_context>
chip_gen: v5e
topology: v5e:2x2
jax: 0.10.0
libtpu: 0.0.40
codegen_flags: <defaults>
</compile_context>

<pallas_src>
import functools
import math

import jax
import jax.numpy as jnp
from jax import lax
from jax.experimental import pallas as pl
from jax.experimental.pallas import tpu as pltpu

BN_EPS = 1e-5

# Sub-pixel decomposition of (nearest 2x upsample) o (3x3 conv, pad 1):
# output row 2*i + a, conv tap ky  ->  low-res row  i + _TAP_MAP[a][ky] - 1
# (same map for columns with parity b and tap kx).
_TAP_MAP = ((0, 1, 1), (1, 1, 2))


# ----------------------------------------------------------------------------
# Pallas kernel
# ----------------------------------------------------------------------------
def _up_conv_kernel(x_ref, w_ref, scale_ref, shift_ref, o_ref, acc_ref, *, m_p, wp):
    """x_ref:     (l_p, Cin)       flattened padded low-res tile (bf16), l_p >= (th+2)*wp + 2
       w_ref:     (9, Cin, 4*Cout) combined sub-pixel conv weights (bf16, no BN scale)
       scale_ref: (1, 4*Cout)      per-channel BN scale (f32)
       shift_ref: (1, 4*Cout)      folded conv bias + BN shift (f32)
       o_ref:     (m_p, 4*Cout)    m_p = th*wp; columns j >= W of each row are junk (stripped later)
       acc_ref:   (m_p, 4*Cout)    f32 accumulator scratch
    """
    for t in range(9):
        ky, kx = divmod(t, 3)
        # every tap is a contiguous sublane window of the flat tile -> no reshape/relayout
        lhs = x_ref[pl.ds(ky * wp + kx, m_p), :]
        part = jnp.dot(lhs, w_ref[t], preferred_element_type=jnp.float32)
        if t == 0:
            acc_ref[...] = part            # overwrite: no zero-init pass needed
        else:
            acc_ref[...] += part           # in-place f32 accumulate (MRB-friendly on v7x)
    y = acc_ref[...] * scale_ref[...] + shift_ref[...]    # f32 epilogue: BN scale/shift
    o_ref[...] = jnp.maximum(y, 0.0).astype(o_ref.dtype)  # ReLU, cast to (bf16) output


# ----------------------------------------------------------------------------
# Tiling / VMEM heuristics
# ----------------------------------------------------------------------------
def _device_kind():
    try:
        return jax.devices()[0].device_kind.lower()
    except Exception:
        return ""


def _vmem_step_bytes(th, w, c_in, c_out, out_bytes):
    """Corrected per-step VMEM estimate for the auto-pipelined kernel."""
    wp, co4 = w + 2, 4 * c_out
    l_p, m_p = (th + 3) * wp, th * wp
    return (2 * l_p * c_in * 2            # input tile, 2 pipeline buffers (bf16)
            + 2 * 9 * c_in * co4 * 2      # combined weights, 2 buffers (bf16)
            + 4 * co4 * 4                 # scale + shift, 2 buffers each (f32)
            + 2 * m_p * co4 * out_bytes   # output tile, 2 buffers
            + m_p * co4 * 4               # f32 accumulator scratch
            + 2 * m_p * c_in * 2          # live LHS tap window(s) (bf16)
            + (2 << 20))                  # compiler internal scratch headroom


def _pick_tile_rows(n, h, w, c_in, c_out, out_bytes):
    """Largest row tile (divisor of H) under the per-generation M / VMEM budgets."""
    kind = _device_kind()
    is_v7 = "v7" in kind
    vmem_cap = (44 << 20) if is_v7 else (96 << 20)
    target_m = 4096 if is_v7 else 8192          # output rows (th*(w+2)) per grid step
    divisors = [d for d in range(1, h + 1) if h % d == 0]
    if is_v7 and n == 1 and h > 1:
        # keep the grid product >= 2 so both v7x TensorCores get work
        capped = [d for d in divisors if d <= h // 2]
        divisors = capped or divisors[:1]
    th = divisors[0]
    for d in divisors:
        if (d * (w + 2) <= target_m
                and _vmem_step_bytes(d, w, c_in, c_out, out_bytes) <= vmem_cap):
            th = d
    return th, vmem_cap


# ----------------------------------------------------------------------------
# Parameter folding / wrapper
# ----------------------------------------------------------------------------
def fold_up_conv_params(p, eps=BN_EPS):
    """Combined sub-pixel conv weights (9, Cin, 4*Cout) plus f32 BN scale / shift.

    The BN scale is kept OUT of the bf16 weights (it is applied in the f32 epilogue), so a
    tiny running variance cannot blow up / round away the folded weights.
    """
    w = p["w"].astype(jnp.float32)                       # (Cout, Cin, 3, 3)
    c_out, c_in = w.shape[0], w.shape[1]
    scale = p["gamma"] / jnp.sqrt(p["var"] + eps)        # (Cout,)
    shift = (p["b"] - p["mean"]) * scale + p["beta"]     # (Cout,)
    w_hwio = jnp.transpose(w, (2, 3, 1, 0))              # (3, 3, Cin, Cout)

    comb = jnp.zeros((3, 3, c_in, 2, 2, c_out), jnp.float32)
    for a in (0, 1):
        for b in (0, 1):
            for ky in range(3):
                for kx in range(3):
                    t, s = _TAP_MAP[a][ky], _TAP_MAP[b][kx]
                    comb = comb.at[t, s, :, a, b, :].add(w_hwio[ky, kx])
    w_comb = comb.reshape(9, c_in, 4 * c_out).astype(jnp.bfloat16)    # conv-only weights
    scale4 = jnp.tile(scale[None, :], (1, 4)).astype(jnp.float32)     # (1, 4*Cout)
    shift4 = jnp.tile(shift[None, :], (1, 4)).astype(jnp.float32)     # (1, 4*Cout)
    return w_comb, scale4, shift4


def up_conv(x_nchw, params, *, tile_rows=None, out_dtype=jnp.bfloat16):
    """up_conv.forward: NCHW in -> NCHW out at 2x spatial resolution (bf16 by default)."""
    n, c_in, h, w = x_nchw.shape
    c_out = params["w"].shape[0]
    co4, wp = 4 * c_out, w + 2
    out_bytes = jnp.dtype(out_dtype).itemsize
    w_comb, scale4, shift4 = fold_up_conv_params(params)

    if tile_rows is None:
        th, vmem_cap = _pick_tile_rows(n, h, w, c_in, c_out, out_bytes)
    else:
        th = max(1, min(int(tile_rows), h))
        while h % th:
            th -= 1
        vmem_cap = (44 << 20) if "v7" in _device_kind() else (96 << 20)
    r = h // th
    l_p, m_p = (th + 3) * wp, th * wp     # flat tile rows (incl. 1 slack row) / output rows

    # NCHW -> NHWC bf16, zero-pad 1 px (+1 extra slack row at the bottom).  Only the
    # (1 + 3/H)-padded LOW-RES map ever reaches HBM, in bf16 — no 4x upsampled map and no
    # 9x im2col tensor.
    x_nhwc = jnp.transpose(x_nchw, (0, 2, 3, 1)).astype(jnp.bfloat16)
    xpad = jnp.pad(x_nhwc, ((0, 0), (1, 2), (1, 1), (0, 0)))          # (N, H+3, W+2, Cin)
    if r == 1:
        x_flat = xpad.reshape(n, 1, l_p, c_in)                        # free reshape, no copy
    else:
        # big row tiles -> halo duplication is only 3/th of the input
        tiles = jnp.stack([xpad[:, i * th:i * th + th + 3] for i in range(r)], axis=1)
        x_flat = tiles.reshape(n, r, l_p, c_in)

    est = _vmem_step_bytes(th, w, c_in, c_out, out_bytes)
    vmem_limit = int(min(vmem_cap, max(est + (8 << 20), 32 << 20)))

    kern = functools.partial(_up_conv_kernel, m_p=m_p, wp=wp)
    out_sub = pl.pallas_call(
        kern,
        out_shape=jax.ShapeDtypeStruct((n, r, m_p, co4), out_dtype),
        grid=(n, r),
        in_specs=[
            pl.BlockSpec((None, None, l_p, c_in), lambda i, j: (i, j, 0, 0)),
            pl.BlockSpec((9, c_in, co4), lambda i, j: (0, 0, 0)),
            pl.BlockSpec((1, co4), lambda i, j: (0, 0)),
            pl.BlockSpec((1, co4), lambda i, j: (0, 0)),
        ],
        out_specs=pl.BlockSpec((None, None, m_p, co4), lambda i, j: (i, j, 0, 0)),
        scratch_shapes=[pltpu.VMEM((m_p, co4), jnp.float32)],
        compiler_params=pltpu.CompilerParams(
            dimension_semantics=("parallel", "parallel"),
            vmem_limit_bytes=vmem_limit),
    )(x_flat, w_comb, scale4, shift4)

    # pixel shuffle (bf16 wrapper glue): strip the 2 junk halo columns, interleave the 2x2
    # sub-pixel outputs (channel = (a*2+b)*Cout + co), and return NCHW.
    out = out_sub.reshape(n, r, th, wp, 2, 2, c_out)[:, :, :, :w]
    out = out.reshape(n, h, w, 2, 2, c_out)
    out = jnp.transpose(out, (0, 1, 3, 2, 4, 5)).reshape(n, 2 * h, 2 * w, c_out)
    return jnp.transpose(out, (0, 3, 1, 2))


# ----------------------------------------------------------------------------
# Parameters + pure-JAX reference
# ----------------------------------------------------------------------------
def init_up_conv_params(key, ch_in, ch_out):
    kw, kb = jax.random.split(key)
    bound = 1.0 / math.sqrt(ch_in * 9)
    return {
        "w": jax.random.uniform(kw, (ch_out, ch_in, 3, 3), jnp.float32, -bound, bound),
        "b": jax.random.uniform(kb, (ch_out,), jnp.float32, -bound, bound),
        "gamma": jnp.ones((ch_out,), jnp.float32),
        "beta": jnp.zeros((ch_out,), jnp.float32),
        "mean": jnp.zeros((ch_out,), jnp.float32),
        "var": jnp.ones((ch_out,), jnp.float32),
    }


def up_conv_reference(x_nchw, params, eps=BN_EPS):
    x = jnp.transpose(x_nchw, (0, 2, 3, 1)).astype(jnp.float32)
    y = jnp.repeat(jnp.repeat(x, 2, axis=1), 2, axis=2)          # nearest upsample 2x
    w_hwio = jnp.transpose(params["w"], (2, 3, 1, 0))
    z = lax.conv_general_dilated(y, w_hwio, (1, 1), ((1, 1), (1, 1)),
                                 dimension_numbers=("NHWC", "HWIO", "NHWC"))
    z = z + params["b"][None, None, None, :]
    scale = params["gamma"] / jnp.sqrt(params["var"] + eps)
    z = (z - params["mean"]) * scale + params["beta"]
    z = jnp.maximum(z, 0.0)
    return jnp.transpose(z, (0, 3, 1, 2))


# ----------------------------------------------------------------------------
# Main
# ----------------------------------------------------------------------------
if __name__ == "__main__":
    key = jax.random.PRNGKey(0)
    kx, kp = jax.random.split(key)
    # "up" stage of the detector U-Net: ch_in=64 -> ch_out=32 (4*Cout = 128 lanes)
    n, ch_in, ch_out, h, w = 2, 64, 32, 16, 16
    x = jax.random.normal(kx, (n, ch_in, h, w), jnp.float32)
    params = init_up_conv_params(kp, ch_in, ch_out)
    ref = up_conv_reference(x, params)

    # default path: auto-picked tiling (whole image per step -> grid (2, 1)), bf16 output
    fwd = jax.jit(up_conv)
    out = jax.block_until_ready(fwd(x, params))
    assert out.shape == (n, ch_out, 2 * h, 2 * w), out.shape
    assert bool(jnp.all(jnp.isfinite(out.astype(jnp.float32))))
    err = float(jnp.max(jnp.abs(out.astype(jnp.float32) - ref)))
    assert err < 5e-2, f"max abs err vs reference (auto tiling): {err}"

    # row-tiled path (grid (2, 2)) to exercise the halo'd multi-tile pipeline as well
    fwd_tiled = jax.jit(functools.partial(up_conv, tile_rows=8))
    out_t = jax.block_until_ready(fwd_tiled(x, params))
    err_t = float(jnp.max(jnp.abs(out_t.astype(jnp.float32) - ref)))
    assert err_t < 5e-2, f"max abs err vs reference (tile_rows=8): {err_t}"

    print("KERNEL_OK")
</pallas_src>

<mosaic_0001>
module attributes {stable_mosaic.version = 11 : i64} {
  func.func @_up_conv_kernel(%arg0: i32, %arg1: i32, %arg2: memref<1x1x342x64xbf16, #tpu.memory_space<vmem>>, %arg3: memref<9x64x128xbf16, #tpu.memory_space<vmem>>, %arg4: memref<1x128xf32, #tpu.memory_space<vmem>>, %arg5: memref<1x128xf32, #tpu.memory_space<vmem>>, %arg6: memref<1x1x288x128xbf16, #tpu.memory_space<vmem>>, %arg7: memref<288x128xf32, #tpu.memory_space<vmem>>) attributes {dimension_semantics = [#tpu.dimension_semantics<parallel>, #tpu.dimension_semantics<parallel>], iteration_bounds = array<i64: 2, 1>, scalar_prefetch = 0 : i64, scratch_operands = 1 : i64, tpu.core_type = #tpu.core_type<tc>, window_params = [{transform_indices = @transform_0, window_bounds = array<i64: 1, 1, 342, 64>}, {pipeline_mode = #tpu.pipeline_mode<synchronous>, transform_indices = @transform_1, window_bounds = array<i64: 9, 64, 128>}, {pipeline_mode = #tpu.pipeline_mode<synchronous>, transform_indices = @transform_2, window_bounds = array<i64: 1, 128>}, {pipeline_mode = #tpu.pipeline_mode<synchronous>, transform_indices = @transform_3, window_bounds = array<i64: 1, 128>}, {transform_indices = @transform_4, window_bounds = array<i64: 1, 1, 288, 128>}]} {
    %c0 = arith.constant 0 : index
    %c0_0 = arith.constant 0 : index
    %c0_1 = arith.constant 0 : index
    %c0_2 = arith.constant 0 : index
    %0 = vector.load %arg2[%c0, %c0_0, %c0_1, %c0_2] : memref<1x1x342x64xbf16, #tpu.memory_space<vmem>>, vector<1x1x288x64xbf16>
    %1 = vector.shape_cast %0 : vector<1x1x288x64xbf16> to vector<288x64xbf16>
    %c0_3 = arith.constant 0 : index
    %c0_4 = arith.constant 0 : index
    %c0_5 = arith.constant 0 : index
    %2 = vector.load %arg3[%c0_3, %c0_4, %c0_5] : memref<9x64x128xbf16, #tpu.memory_space<vmem>>, vector<1x64x128xbf16>
    %3 = vector.shape_cast %2 : vector<1x64x128xbf16> to vector<64x128xbf16>
    %cst = arith.constant dense<0.000000e+00> : vector<288x128xf32>
    %4 = tpu.matmul %1, %3, %cst {dimension_numbers = #tpu.dot_dimension_numbers<[1], [0], [0], [1], [0, 0, 1, 1], [], []>} : vector<288x64xbf16>, vector<64x128xbf16>, vector<288x128xf32> -> vector<288x128xf32>
    %c0_6 = arith.constant 0 : index
    %c0_7 = arith.constant 0 : index
    %5 = vector.load %arg7[%c0_6, %c0_7] : memref<288x128xf32, #tpu.memory_space<vmem>>, vector<288x128xf32>
    tpu.vector_store %arg7[%c0_6, %c0_7], %4 {strides = array<i32>} : memref<288x128xf32, #tpu.memory_space<vmem>>, vector<288x128xf32>,
    %c0_8 = arith.constant 0 : index
    %c0_9 = arith.constant 0 : index
    %c1 = arith.constant 1 : index
    %c0_10 = arith.constant 0 : index
    %6 = vector.load %arg2[%c0_8, %c0_9, %c1, %c0_10] : memref<1x1x342x64xbf16, #tpu.memory_space<vmem>>, vector<1x1x288x64xbf16>
    %7 = vector.shape_cast %6 : vector<1x1x288x64xbf16> to vector<288x64xbf16>
    %c1_11 = arith.constant 1 : index
    %c0_12 = arith.constant 0 : index
    %c0_13 = arith.constant 0 : index
    %8 = vector.load %arg3[%c1_11, %c0_12, %c0_13] : memref<9x64x128xbf16, #tpu.memory_space<vmem>>, vector<1x64x128xbf16>
    %9 = vector.shape_cast %8 : vector<1x64x128xbf16> to vector<64x128xbf16>
    %cst_14 = arith.constant dense<0.000000e+00> : vector<288x128xf32>
    %10 = tpu.matmul %7, %9, %cst_14 {dimension_numbers = #tpu.dot_dimension_numbers<[1], [0], [0], [1], [0, 0, 1, 1], [], []>} : vector<288x64xbf16>, vector<64x128xbf16>, vector<288x128xf32> -> vector<288x128xf32>
    %c0_15 = arith.constant 0 : index
    %c0_16 = arith.constant 0 : index
    %11 = vector.load %arg7[%c0_15, %c0_16] : memref<288x128xf32, #tpu.memory_space<vmem>>, vector<288x128xf32>
    %12 = arith.addf %11, %10 : vector<288x128xf32>
    %c0_17 = arith.constant 0 : index
    %c0_18 = arith.constant 0 : index
    %13 = vector.load %arg7[%c0_17, %c0_18] : memref<288x128xf32, #tpu.memory_space<vmem>>, vector<288x128xf32>
    tpu.vector_store %arg7[%c0_17, %c0_18], %12 {strides = array<i32>} : memref<288x128xf32, #tpu.memory_space<vmem>>, vector<288x128xf32>,
    %c0_19 = arith.constant 0 : index
    %c0_20 = arith.constant 0 : index
    %c2 = arith.constant 2 : index
    %c0_21 = arith.constant 0 : index
    %14 = vector.load %arg2[%c0_19, %c0_20, %c2, %c0_21] : memref<1x1x342x64xbf16, #tpu.memory_space<vmem>>, vector<1x1x288x64xbf16>
    %15 = vector.shape_cast %14 : vector<1x1x288x64xbf16> to vector<288x64xbf16>
    %c2_22 = arith.constant 2 : index
    %c0_23 = arith.constant 0 : index
    %c0_24 = arith.constant 0 : index
    %16 = vector.load %arg3[%c2_22, %c0_23, %c0_24] : memref<9x64x128xbf16, #tpu.memory_space<vmem>>, vector<1x64x128xbf16>
    %17 = vector.shape_cast %16 : vector<1x64x128xbf16> to vector<64x128xbf16>
    %cst_25 = arith.constant dense<0.000000e+00> : vector<288x128xf32>
    %18 = tpu.matmul %15, %17, %cst_25 {dimension_numbers = #tpu.dot_dimension_numbers<[1], [0], [0], [1], [0, 0, 1, 1], [], []>} : vector<288x64xbf16>, vector<64x128xbf16>, vector<288x128xf32> -> vector<288x128xf32>
    %c0_26 = arith.constant 0 : index
    %c0_27 = arith.constant 0 : index
    %19 = vector.load %arg7[%c0_26, %c0_27] : memref<288x128xf32, #tpu.memory_space<vmem>>, vector<288x128xf32>
    %20 = arith.addf %19, %18 : vector<288x128xf32>
    %c0_28 = arith.constant 0 : index
    %c0_29 = arith.constant 0 : index
    %21 = vector.load %arg7[%c0_28, %c0_29] : memref<288x128xf32, #tpu.memory_space<vmem>>, vector<288x128xf32>
    tpu.vector_store %arg7[%c0_28, %c0_29], %20 {strides = array<i32>} : memref<288x128xf32, #tpu.memory_space<vmem>>, vector<288x128xf32>,
    %c0_30 = arith.constant 0 : index
    %c0_31 = arith.constant 0 : index
    %c18 = arith.constant 18 : index
    %c0_32 = arith.constant 0 : index
    %22 = vector.load %arg2[%c0_30, %c0_31, %c18, %c0_32] : memref<1x1x342x64xbf16, #tpu.memory_space<vmem>>, vector<1x1x288x64xbf16>
    %23 = vector.shape_cast %22 : vector<1x1x288x64xbf16> to vector<288x64xbf16>
    %c3 = arith.constant 3 : index
    %c0_33 = arith.constant 0 : index
    %c0_34 = arith.constant 0 : index
    %24 = vector.load %arg3[%c3, %c0_33, %c0_34] : memref<9x64x128xbf16, #tpu.memory_space<vmem>>, vector<1x64x128xbf16>
    %25 = vector.shape_cast %24 : vector<1x64x128xbf16> to vector<64x128xbf16>
    %cst_35 = arith.constant dense<0.000000e+00> : vector<288x128xf32>
    %26 = tpu.matmul %23, %25, %cst_35 {dimension_numbers = #tpu.dot_dimension_numbers<[1], [0], [0], [1], [0, 0, 1, 1], [], []>} : vector<288x64xbf16>, vector<64x128xbf16>, vector<288x128xf32> -> vector<288x128xf32>
    %c0_36 = arith.constant 0 : index
    %c0_37 = arith.constant 0 : index
    %27 = vector.load %arg7[%c0_36, %c0_37] : memref<288x128xf32, #tpu.memory_space<vmem>>, vector<288x128xf32>
    %28 = arith.addf %27, %26 : vector<288x128xf32>
    %c0_38 = arith.constant 0 : index
    %c0_39 = arith.constant 0 : index
    %29 = vector.load %arg7[%c0_38, %c0_39] : memref<288x128xf32, #tpu.memory_space<vmem>>, vector<288x128xf32>
    tpu.vector_store %arg7[%c0_38, %c0_39], %28 {strides = array<i32>} : memref<288x128xf32, #tpu.memory_space<vmem>>, vector<288x128xf32>,
    %c0_40 = arith.constant 0 : index
    %c0_41 = arith.constant 0 : index
    %c19 = arith.constant 19 : index
    %c0_42 = arith.constant 0 : index
    %30 = vector.load %arg2[%c0_40, %c0_41, %c19, %c0_42] : memref<1x1x342x64xbf16, #tpu.memory_space<vmem>>, vector<1x1x288x64xbf16>
    %31 = vector.shape_cast %30 : vector<1x1x288x64xbf16> to vector<288x64xbf16>
    %c4 = arith.constant 4 : index
    %c0_43 = arith.constant 0 : index
    %c0_44 = arith.constant 0 : index
    %32 = vector.load %arg3[%c4, %c0_43, %c0_44] : memref<9x64x128xbf16, #tpu.memory_space<vmem>>, vector<1x64x128xbf16>
    %33 = vector.shape_cast %32 : vector<1x64x128xbf16> to vector<64x128xbf16>
    %cst_45 = arith.constant dense<0.000000e+00> : vector<288x128xf32>
    %34 = tpu.matmul %31, %33, %cst_45 {dimension_numbers = #tpu.dot_dimension_numbers<[1], [0], [0], [1], [0, 0, 1, 1], [], []>} : vector<288x64xbf16>, vector<64x128xbf16>, vector<288x128xf32> -> vector<288x128xf32>
    %c0_46 = arith.constant 0 : index
    %c0_47 = arith.constant 0 : index
    %35 = vector.load %arg7[%c0_46, %c0_47] : memref<288x128xf32, #tpu.memory_space<vmem>>, vector<288x128xf32>
    %36 = arith.addf %35, %34 : vector<288x128xf32>
    %c0_48 = arith.constant 0 : index
    %c0_49 = arith.constant 0 : index
    %37 = vector.load %arg7[%c0_48, %c0_49] : memref<288x128xf32, #tpu.memory_space<vmem>>, vector<288x128xf32>
    tpu.vector_store %arg7[%c0_48, %c0_49], %36 {strides = array<i32>} : memref<288x128xf32, #tpu.memory_space<vmem>>, vector<288x128xf32>,
    %c0_50 = arith.constant 0 : index
    %c0_51 = arith.constant 0 : index
    %c20 = arith.constant 20 : index
    %c0_52 = arith.constant 0 : index
    %38 = vector.load %arg2[%c0_50, %c0_51, %c20, %c0_52] : memref<1x1x342x64xbf16, #tpu.memory_space<vmem>>, vector<1x1x288x64xbf16>
    %39 = vector.shape_cast %38 : vector<1x1x288x64xbf16> to vector<288x64xbf16>
    %c5 = arith.constant 5 : index
    %c0_53 = arith.constant 0 : index
    %c0_54 = arith.constant 0 : index
    %40 = vector.load %arg3[%c5, %c0_53, %c0_54] : memref<9x64x128xbf16, #tpu.memory_space<vmem>>, vector<1x64x128xbf16>
    %41 = vector.shape_cast %40 : vector<1x64x128xbf16> to vector<64x128xbf16>
    %cst_55 = arith.constant dense<0.000000e+00> : vector<288x128xf32>
    %42 = tpu.matmul %39, %41, %cst_55 {dimension_numbers = #tpu.dot_dimension_numbers<[1], [0], [0], [1], [0, 0, 1, 1], [], []>} : vector<288x64xbf16>, vector<64x128xbf16>, vector<288x128xf32> -> vector<288x128xf32>
    %c0_56 = arith.constant 0 : index
    %c0_57 = arith.constant 0 : index
    %43 = vector.load %arg7[%c0_56, %c0_57] : memref<288x128xf32, #tpu.memory_space<vmem>>, vector<288x128xf32>
    %44 = arith.addf %43, %42 : vector<288x128xf32>
    %c0_58 = arith.constant 0 : index
    %c0_59 = arith.constant 0 : index
    %45 = vector.load %arg7[%c0_58, %c0_59] : memref<288x128xf32, #tpu.memory_space<vmem>>, vector<288x128xf32>
    tpu.vector_store %arg7[%c0_58, %c0_59], %44 {strides = array<i32>} : memref<288x128xf32, #tpu.memory_space<vmem>>, vector<288x128xf32>,
    %c0_60 = arith.constant 0 : index
    %c0_61 = arith.constant 0 : index
    %c36 = arith.constant 36 : index
    %c0_62 = arith.constant 0 : index
    %46 = vector.load %arg2[%c0_60, %c0_61, %c36, %c0_62] : memref<1x1x342x64xbf16, #tpu.memory_space<vmem>>, vector<1x1x288x64xbf16>
    %47 = vector.shape_cast %46 : vector<1x1x288x64xbf16> to vector<288x64xbf16>
    %c6 = arith.constant 6 : index
    %c0_63 = arith.constant 0 : index
    %c0_64 = arith.constant 0 : index
    %48 = vector.load %arg3[%c6, %c0_63, %c0_64] : memref<9x64x128xbf16, #tpu.memory_space<vmem>>, vector<1x64x128xbf16>
    %49 = vector.shape_cast %48 : vector<1x64x128xbf16> to vector<64x128xbf16>
    %cst_65 = arith.constant dense<0.000000e+00> : vector<288x128xf32>
    %50 = tpu.matmul %47, %49, %cst_65 {dimension_numbers = #tpu.dot_dimension_numbers<[1], [0], [0], [1], [0, 0, 1, 1], [], []>} : vector<288x64xbf16>, vector<64x128xbf16>, vector<288x128xf32> -> vector<288x128xf32>
    %c0_66 = arith.constant 0 : index
    %c0_67 = arith.constant 0 : index
    %51 = vector.load %arg7[%c0_66, %c0_67] : memref<288x128xf32, #tpu.memory_space<vmem>>, vector<288x128xf32>
    %52 = arith.addf %51, %50 : vector<288x128xf32>
    %c0_68 = arith.constant 0 : index
    %c0_69 = arith.constant 0 : index
    %53 = vector.load %arg7[%c0_68, %c0_69] : memref<288x128xf32, #tpu.memory_space<vmem>>, vector<288x128xf32>
    tpu.vector_store %arg7[%c0_68, %c0_69], %52 {strides = array<i32>} : memref<288x128xf32, #tpu.memory_space<vmem>>, vector<288x128xf32>,
    %c0_70 = arith.constant 0 : index
    %c0_71 = arith.constant 0 : index
    %c37 = arith.constant 37 : index
    %c0_72 = arith.constant 0 : index
    %54 = vector.load %arg2[%c0_70, %c0_71, %c37, %c0_72] : memref<1x1x342x64xbf16, #tpu.memory_space<vmem>>, vector<1x1x288x64xbf16>
    %55 = vector.shape_cast %54 : vector<1x1x288x64xbf16> to vector<288x64xbf16>
    %c7 = arith.constant 7 : index
    %c0_73 = arith.constant 0 : index
    %c0_74 = arith.constant 0 : index
    %56 = vector.load %arg3[%c7, %c0_73, %c0_74] : memref<9x64x128xbf16, #tpu.memory_space<vmem>>, vector<1x64x128xbf16>
    %57 = vector.shape_cast %56 : vector<1x64x128xbf16> to vector<64x128xbf16>
    %cst_75 = arith.constant dense<0.000000e+00> : vector<288x128xf32>
    %58 = tpu.matmul %55, %57, %cst_75 {dimension_numbers = #tpu.dot_dimension_numbers<[1], [0], [0], [1], [0, 0, 1, 1], [], []>} : vector<288x64xbf16>, vector<64x128xbf16>, vector<288x128xf32> -> vector<288x128xf32>
    %c0_76 = arith.constant 0 : index
    %c0_77 = arith.constant 0 : index
    %59 = vector.load %arg7[%c0_76, %c0_77] : memref<288x128xf32, #tpu.memory_space<vmem>>, vector<288x128xf32>
    %60 = arith.addf %59, %58 : vector<288x128xf32>
    %c0_78 = arith.constant 0 : index
    %c0_79 = arith.constant 0 : index
    %61 = vector.load %arg7[%c0_78, %c0_79] : memref<288x128xf32, #tpu.memory_space<vmem>>, vector<288x128xf32>
    tpu.vector_store %arg7[%c0_78, %c0_79], %60 {strides = array<i32>} : memref<288x128xf32, #tpu.memory_space<vmem>>, vector<288x128xf32>,
    %c0_80 = arith.constant 0 : index
    %c0_81 = arith.constant 0 : index
    %c38 = arith.constant 38 : index
    %c0_82 = arith.constant 0 : index
    %62 = vector.load %arg2[%c0_80, %c0_81, %c38, %c0_82] : memref<1x1x342x64xbf16, #tpu.memory_space<vmem>>, vector<1x1x288x64xbf16>
    %63 = vector.shape_cast %62 : vector<1x1x288x64xbf16> to vector<288x64xbf16>
    %c8 = arith.constant 8 : index
    %c0_83 = arith.constant 0 : index
    %c0_84 = arith.constant 0 : index
    %64 = vector.load %arg3[%c8, %c0_83, %c0_84] : memref<9x64x128xbf16, #tpu.memory_space<vmem>>, vector<1x64x128xbf16>
    %65 = vector.shape_cast %64 : vector<1x64x128xbf16> to vector<64x128xbf16>
    %cst_85 = arith.constant dense<0.000000e+00> : vector<288x128xf32>
    %66 = tpu.matmul %63, %65, %cst_85 {dimension_numbers = #tpu.dot_dimension_numbers<[1], [0], [0], [1], [0, 0, 1, 1], [], []>} : vector<288x64xbf16>, vector<64x128xbf16>, vector<288x128xf32> -> vector<288x128xf32>
    %c0_86 = arith.constant 0 : index
    %c0_87 = arith.constant 0 : index
    %67 = vector.load %arg7[%c0_86, %c0_87] : memref<288x128xf32, #tpu.memory_space<vmem>>, vector<288x128xf32>
    %68 = arith.addf %67, %66 : vector<288x128xf32>
    %c0_88 = arith.constant 0 : index
    %c0_89 = arith.constant 0 : index
    %69 = vector.load %arg7[%c0_88, %c0_89] : memref<288x128xf32, #tpu.memory_space<vmem>>, vector<288x128xf32>
    tpu.vector_store %arg7[%c0_88, %c0_89], %68 {strides = array<i32>} : memref<288x128xf32, #tpu.memory_space<vmem>>, vector<288x128xf32>,
    %c0_90 = arith.constant 0 : index
    %c0_91 = arith.constant 0 : index
    %70 = vector.load %arg7[%c0_90, %c0_91] : memref<288x128xf32, #tpu.memory_space<vmem>>, vector<288x128xf32>
    %c0_92 = arith.constant 0 : index
    %c0_93 = arith.constant 0 : index
    %71 = vector.load %arg4[%c0_92, %c0_93] : memref<1x128xf32, #tpu.memory_space<vmem>>, vector<1x128xf32>
    %72 = vector.broadcast %71 : vector<1x128xf32> to vector<288x128xf32>
    %73 = arith.mulf %70, %72 : vector<288x128xf32>
    %c0_94 = arith.constant 0 : index
    %c0_95 = arith.constant 0 : index
    %74 = vector.load %arg5[%c0_94, %c0_95] : memref<1x128xf32, #tpu.memory_space<vmem>>, vector<1x128xf32>
    %75 = vector.broadcast %74 : vector<1x128xf32> to vector<288x128xf32>
    %76 = arith.addf %73, %75 : vector<288x128xf32>
    %cst_96 = arith.constant 0.000000e+00 : f32
    %77 = vector.broadcast %cst_96 : f32 to vector<288x128xf32>
    %78 = arith.maximumf %76, %77 : vector<288x128xf32>
    %79 = arith.truncf %78 : vector<288x128xf32> to vector<288x128xbf16>
    %c0_97 = arith.constant 0 : index
    %c0_98 = arith.constant 0 : index
    %c0_99 = arith.constant 0 : index
    %c0_100 = arith.constant 0 : index
    %80 = vector.load %arg6[%c0_97, %c0_98, %c0_99, %c0_100] : memref<1x1x288x128xbf16, #tpu.memory_space<vmem>>, vector<1x1x288x128xbf16>
    %81 = vector.shape_cast %80 : vector<1x1x288x128xbf16> to vector<288x128xbf16>
    %82 = vector.shape_cast %79 : vector<288x128xbf16> to vector<1x1x288x128xbf16>
    tpu.vector_store %arg6[%c0_97, %c0_98, %c0_99, %c0_100], %82 {strides = array<i32>} : memref<1x1x288x128xbf16, #tpu.memory_space<vmem>>, vector<1x1x288x128xbf16>,
    return
  }
  func.func @transform_0(%arg0: i32, %arg1: i32) -> (i32, i32, i32, i32) {
    %c0_i32 = arith.constant 0 : i32
    %c0_i32_0 = arith.constant 0 : i32
    %c0_i32_1 = arith.constant 0 : i32
    return %arg0, %arg1, %c0_i32, %c0_i32_0 : i32, i32, i32, i32
  }
  func.func @transform_1(%arg0: i32, %arg1: i32) -> (i32, i32, i32) {
    %c0_i32 = arith.constant 0 : i32
    %c0_i32_0 = arith.constant 0 : i32
    %c0_i32_1 = arith.constant 0 : i32
    %c0_i32_2 = arith.constant 0 : i32
    return %c0_i32, %c0_i32_0, %c0_i32_1 : i32, i32, i32
  }
  func.func @transform_2(%arg0: i32, %arg1: i32) -> (i32, i32) {
    %c0_i32 = arith.constant 0 : i32
    %c0_i32_0 = arith.constant 0 : i32
    %c0_i32_1 = arith.constant 0 : i32
    return %c0_i32, %c0_i32_0 : i32, i32
  }
  func.func @transform_3(%arg0: i32, %arg1: i32) -> (i32, i32) {
    %c0_i32 = arith.constant 0 : i32
    %c0_i32_0 = arith.constant 0 : i32
    %c0_i32_1 = arith.constant 0 : i32
    return %c0_i32, %c0_i32_0 : i32, i32
  }
  func.func @transform_4(%arg0: i32, %arg1: i32) -> (i32, i32, i32, i32) {
    %c0_i32 = arith.constant 0 : i32
    %c0_i32_0 = arith.constant 0 : i32
    %c0_i32_1 = arith.constant 0 : i32
    return %arg0, %arg1, %c0_i32, %c0_i32_0 : i32, i32, i32, i32
  }
}

</mosaic_0001>

<bundles_post_ra>
// kernel: up_conv.1
= control target key start
LH: loop header
LB: loop body
LE: loop exit
PB: predicated region body
PF: predicated region fallthrough
CT: control target
= control target key end

     0   :  { %s6393_s15 = smov 0   ;;  %s6395_s16 = smov 0   ;;  %s7607_s0 = inlined_call_operand.vmem [shape: bf16[2,1,342,64], index: 0, kind: input, shape index: {}]   ;;  %s7608_s1 = inlined_call_operand.vmem [shape: bf16[9,64,128], index: 1, kind: input, shape index: {}]   ;;  %s7609_s2 = inlined_call_operand.vmem [shape: f32[1,128], index: 2, kind: input, shape index: {}]   ;;  %s7610_s3 = inlined_call_operand.vmem [shape: f32[1,128], index: 3, kind: input, shape index: {}]   ;;  %s7611_s4 = inlined_call_operand.vmem [shape: bf16[2,1,288,128], index: 4, kind: output, shape index: {}]  }
   0x1   :  { %s6397_s17 = smov 0  }
   0x2 LB: > { %s26_s18 = sadd.s32 1, %s6362_s16  ;;  %p4974_p0 = scmp.ge.s32.totalorder %s6366_s17, 1  ;;  %s6366_s17 = sphi %s6397_s17, %s14_s17   ;;  %s6362_s16 = sphi %s6395_s16, %s7629_s16   ;;  %s6358_s15 = sphi %s6393_s15, %s7628_s15  }
   0x3   : > { %p28_p1 = scmp.ge.s32.totalorder %s26_s18, 2  ;;  %p182_p2 = scmp.lt.s32.totalorder %s6366_s17, 3 }
   0x5   : > { %s7631_s18 = smov (%p28_p1, %s26_s18), 0  ;;  %p183_p3 = pnand %p4974_p0, %p182_p2 }
   0x7   : > { %186 = sbr.rel (%p183_p3) target bundleno = 823 (0x337), region = 36 }
   0xc   : > { %v6018_v0 = vld [vmem:[%s7608_s1 + $0x18] sm:$0xff]  ;;  %p216_p4 = scmp.lt.s32.totalorder %s6358_s15, 1  ;;  %v6017_v1 = vld [vmem:[%s7608_s1 + $0x10] sm:$0xff]  ;;  %v6016_v2 = vld [vmem:[%s7608_s1 + $0x8] sm:$0xff]  ;;  %vm393_vm0 = vcmask 523264   ;;  %vm1295_vm1 = vcmask 1046528  }
   0xd   : > { %6302 = vmatpush.bf16.msra.mxu1 %v6018_v0  ;;  %6303 = vmatpush.bf16.msra.mxu2 %v6018_v0  ;;  %v6015_v3 = vld [vmem:[%s7608_s1] sm:$0xff]  ;;  %v6062_v4 = vld [vmem:[%s7608_s1 + $0x58] sm:$0xff]  ;;  %v6061_v10 = vld [vmem:[%s7608_s1 + $0x50] sm:$0xff]  ;;  %vm722_vm2 = vsmask.f32 7424  ;;  %vm2813_vm5 = vcmask 1045504  }
   0xe   : > { %s7633_s15 = smov (!%p216_p4, %s6358_s15), 1  ;;  %452 = vmatpush.bf16.msra.mxu0 %v6018_v0  ;;  %6304 = vmatpush.bf16.msra.mxu3 %v6018_v0  ;;  %v6040_v5 = vld [vmem:[%s7608_s1 + $0x38] sm:$0xff]  ;;  %v6039_v11 = vld [vmem:[%s7608_s1 + $0x30] sm:$0xff]  ;;  %v6060_v15 = vld [vmem:[%s7608_s1 + $0x48] sm:$0xff]  ;;  %vm2218_vm3 = vsmask.f32 6400 }
   0xf   : > { %s6314_s25 = smul.u32 172, %s7633_s15  ;;  %v6106_v6 = vld [vmem:[%s7608_s1 + $0x98] sm:$0xff]  ;;  %v6105_v12 = vld [vmem:[%s7608_s1 + $0x90] sm:$0xff]  ;;  %v6038_v16 = vld [vmem:[%s7608_s1 + $0x28] sm:$0xff]  ;;  %vm3736_vm4 = vsmask.f32 5376 }
  0x10   : > { %v6084_v14 = vld [vmem:[%s7608_s1 + $0x78] sm:$0xff]  ;;  %v6083_v17 = vld [vmem:[%s7608_s1 + $0x70] sm:$0xff]  ;;  %v6104_v22 = vld [vmem:[%s7608_s1 + $0x88] sm:$0xff]  ;;  %vm4331_vm6 = vcmask 1044480   ;;  %s6315_s10 = smul.u32 144, %s7633_s15 }
  0x11   : > { %6305 = vmatpush.bf16.msra.mxu1 %v6017_v1  ;;  %6306 = vmatpush.bf16.msra.mxu2 %v6017_v1  ;;  %s6429_s30 = scalar_lea.vmem %s7607_s0, %s6314_s25  ;;  %v6082_v23 = vld [vmem:[%s7608_s1 + $0x68] sm:$0xff]  ;;  %v6059_v24 = vld [vmem:[%s7608_s1 + $0x40] sm:$0xff]  ;;  %v6150_v41 = vld [vmem:[%s7608_s1 + $0xd8] sm:$0xff] }
  0x12   : > { %453 = vmatpush.bf16.msra.mxu0 %v6017_v1  ;;  %6307 = vmatpush.bf16.msra.mxu3 %v6017_v1  ;;  %v6002_v7 = vld [vmem:[%s6429_s30 + $0x28] sm:$0xff]  ;;  %v6007_v8 = vld [vmem:[%s6429_s30 + $0x50] sm:$0xff]  ;;  %v5997_v9 = vld [vmem:[%s6429_s30] sm:$0xff]  ;;  %s7307_s12 = scalar_lea.vmem %s7611_s4, %s6315_s10 }
  0x13   : > { %v6012_v13 = vld [vmem:[%s6429_s30 + $0x78] sm:$0xff]  ;;  %v6003_v18 = vld [vmem:[%s6429_s30 + $0x30] sm:$0xff]  ;;  %v5998_v20 = vld [vmem:[%s6429_s30 + $0x8] sm:$0xff] }
  0x14   : > { %v6008_v19 = vld [vmem:[%s6429_s30 + $0x58] sm:$0xff]  ;;  %v6013_v21 = vld [vmem:[%s6429_s30 + $0x80] sm:$0xff]  ;;  %v5999_v27 = vld [vmem:[%s6429_s30 + $0x10] sm:$0xff] }
  0x15   : > { %6308 = vmatpush.bf16.msra.mxu1 %v6016_v2  ;;  %6309 = vmatpush.bf16.msra.mxu2 %v6016_v2  ;;  %v6004_v25 = vld [vmem:[%s6429_s30 + $0x38] sm:$0xff]  ;;  %v6009_v26 = vld [vmem:[%s6429_s30 + $0x60] sm:$0xff]  ;;  %v6014_v28 = vld [vmem:[%s6429_s30 + $0x88] sm:$0xff] }
  0x16   : > { %454 = vmatpush.bf16.msra.mxu0 %v6016_v2  ;;  %6310 = vmatpush.bf16.msra.mxu3 %v6016_v2  ;;  %v6037_v29 = vld [vmem:[%s7608_s1 + $0x20] sm:$0xff]  ;;  %v5321_v32 = vld [vmem:[%s6429_s30 + $0x8] sm:$0xe]  ;;  %v6063_v33 = vld [vmem:[%s6429_s30 + $0x8] sm:$0xf0] }
  0x17   : > { %v6081_v30 = vld [vmem:[%s7608_s1 + $0x60] sm:$0xff]  ;;  %v6064_v34 = vld [vmem:[%s6429_s30 + $0x10] sm:$0xff]  ;;  %v5322_v35 = vor.u32 %v6063_v33, %v5321_v32  ;;  %v6010_v37 = vld [vmem:[%s6429_s30 + $0x68] sm:$0xff] }
  0x18   : > { %v6103_v31 = vld [vmem:[%s7608_s1 + $0x80] sm:$0xff]  ;;  %v6000_v38 = vld [vmem:[%s6429_s30 + $0x18] sm:$0xff]  ;;  %v1758_v40 = vrot.slane %v6064_v34, 1  ;;  %v5435_v47 = vld [vmem:[%s6429_s30 + $0x8] sm:$0xe] }
  0x19   : > { %6311 = vmatpush.bf16.msra.mxu1 %v6015_v3  ;;  %6312 = vmatpush.bf16.msra.mxu2 %v6015_v3  ;;  %v6005_v36 = vld [vmem:[%s6429_s30 + $0x40] sm:$0xff]  ;;  %v1757_v39 = vrot.slane %v5322_v35, 1  ;;  %v6172_v43 = vld [vmem:[%s7608_s1 + $0xf8] sm:$0xff]  ;;  %v6085_v48 = vld [vmem:[%s6429_s30 + $0x8] sm:$0xf0] }
  0x1a   : > { %455 = vmatpush.bf16.msra.mxu0 %v6015_v3  ;;  %6313 = vmatpush.bf16.msra.mxu3 %v6015_v3  ;;  %v6128_v44 = vld [vmem:[%s7608_s1 + $0xb8] sm:$0xff]  ;;  %v6006_v49 = vld [vmem:[%s6429_s30 + $0x48] sm:$0xff]  ;;  %v6011_v50 = vld [vmem:[%s6429_s30 + $0x70] sm:$0xff]  ;;  %v5436_v55 = vor.u32 %v6085_v48, %v5435_v47 }
  0x1b   : > { %v1759_v42 = vsel %vm1295_vm1, %v1757_v39, %v1758_v40  ;;  %v6194_v45 = vld [vmem:[%s7608_s1 + $0x118] sm:$0xff]  ;;  %v6001_v51 = vld [vmem:[%s6429_s30 + $0x20] sm:$0xff]  ;;  %v6086_v54 = vld [vmem:[%s6429_s30 + $0x10] sm:$0xff] }
  0x1c   : > { %5070 = vmatmul.msk.bf16.vlgmr.msra.gmra.mxu1 %vm393_vm0, %v6002_v7  ;;  %5075 = vmatmul.msk.bf16.vlgmr.msra.gmra.mxu2 %vm393_vm0, %v6007_v8  ;;  %v6065_v46 = vld [vmem:[%s6429_s30 + $0x18] sm:$0xff]  ;;  %v6019_v52 = vld [vmem:[%s6429_s30] sm:$0xff]  ;;  %v6020_v56 = vld [vmem:[%s6429_s30 + $0x8] sm:$0xff]  ;;  %v2220_v61 = vshrl.u32 %v5436_v55, 16  ;;  %v2223_v62 = vshll.u32 %v5436_v55, 16  ;;  %v2228_v63 = vshrl.u32 %v6086_v54, 16 }
  0x1d   : > { %1415 = vmatpush.bf16.msrb.mxu2 %v6062_v4  ;;  %953 = vmatpush.bf16.msrb.mxu1 %v6040_v5  ;;  %v1760_v53 = vrot.slane %v6065_v46, 1  ;;  %v726_v57 = vshll.u32 %v6019_v52, 16  ;;  %v5207_v58 = vld [vmem:[%s6429_s30] sm:$0xe]  ;;  %v6041_v60 = vld [vmem:[%s6429_s30] sm:$0xf0] }
  0x1e   : > { %2471 = vmatpush.bf16.msrb.mxu0 %v6106_v6  ;;  %5080 = vmatmul.msk.bf16.vlgmr.msra.gmra.mxu3 %vm393_vm0, %v6012_v13  ;;  %v2231_v0 = vshll.u32 %v6086_v54, 16  ;;  %v724_v1 = vshrl.u32 %v6019_v52, 16  ;;  %v731_v3 = vshll.u32 %v6020_v56, 16  ;;  %v6042_v4 = vld [vmem:[%s6429_s30 + $0x8] sm:$0xff]  ;;  %v5208_v5 = vor.u32 %v6041_v60, %v5207_v58  ;;  %v6044_v47 = vld [vmem:[%s6429_s30 + $0x18] sm:$0xff]  ;;  %v6023_v60 = vld [vmem:[%s6429_s30 + $0x20] sm:$0xff] }
  0x1f   : > { %5065 = vmatmul.msk.bf16.vlgmr.msra.gmra.mxu0 %vm393_vm0, %v5997_v9  ;;  %1876 = vmatpush.bf16.msrb.mxu3 %v6084_v14  ;;  %v1761_v59 = vsel %vm1295_vm1, %v1758_v40, %v1760_v53  ;;  %v728_v2 = vrot.slane %v726_v57, 1  ;;  %v2222_v6 = vrot.slane %v2220_v61, 1  ;;  %v2225_v7 = vrot.slane %v2223_v62, 2  ;;  %v6066_v14 = vld [vmem:[%s6429_s30 + $0x20] sm:$0xff]  ;;  %v6067_v34 = vld [vmem:[%s6429_s30 + $0x28] sm:$0xff] }
  0x20   : > { %v2230_v8 = vrot.slane %v2228_v63, 1  ;;  %v2233_v9 = vrot.slane %v2231_v0, 2  ;;  %v1297_v13 = vrot.slane %v6042_v4, 1  ;;  %v6088_v40 = vld [vmem:[%s6429_s30 + $0x20] sm:$0xff]  ;;  %v1301_v52 = vrot.slane %v6044_v47, 1 }
  0x21   : > { %1416 = vmatpush.bf16.msrb.mxu2 %v6061_v10  ;;  %954 = vmatpush.bf16.msrb.mxu1 %v6039_v11  ;;  %v729_v10 = vor.u32 %v728_v2, %v724_v1  ;;  %v733_v11 = vrot.slane %v731_v3, 1  ;;  %v755_v1 = vshll.u32 %v6023_v60, 16  ;;  %v6045_v2 = vld [vmem:[%s6429_s30 + $0x20] sm:$0xff] }
  0x22   : > { %2472 = vmatpush.bf16.msrb.mxu0 %v6105_v12  ;;  %v1296_v12 = vrot.slane %v5208_v5, 1  ;;  %v6149_v5 = vld [vmem:[%s7608_s1 + $0xd0] sm:$0xff] }
  0x23   : > { %1877 = vmatpush.bf16.msrb.mxu3 %v6083_v17  ;;  %v734_v17 = vsel %vm722_vm2, %v729_v10, %v733_v11  ;;  %v6069_v10 = vld [vmem:[%s6429_s30 + $0x38] sm:$0xff] }
  0x25   : > { %1417 = vmatpush.bf16.msrb.mxu2 %v6060_v15  ;;  %955 = vmatpush.bf16.msrb.mxu1 %v6038_v16  ;;  %v2226_v15 = vor.u32 %v2225_v7, %v2222_v6  ;;  %v2234_v16 = vor.u32 %v2233_v9, %v2230_v8  ;;  %v6171_v6 = vld [vmem:[%s7608_s1 + $0xf0] sm:$0xff]  ;;  %v757_v8 = vrot.slane %v755_v1, 1  ;;  %v1303_v9 = vrot.slane %v6045_v2, 1 }
  0x26   : > { %2473 = vmatpush.bf16.msrb.mxu0 %v6104_v22  ;;  %v6021_v22 = vld [vmem:[%s6429_s30 + $0x10] sm:$0xff] }
  0x27   : > { %1878 = vmatpush.bf16.msrb.mxu3 %v6082_v23 }
  0x29   : > { %1418 = vmatpush.bf16.msrb.mxu2 %v6059_v24  ;;  %956 = vmatpush.bf16.msrb.mxu1 %v6037_v29 }
  0x2a   : > { %2474 = vmatpush.bf16.msrb.mxu0 %v6103_v31 }
  0x2b   : > { %1879 = vmatpush.bf16.msrb.mxu3 %v6081_v30 }
  0x2c   : > { %5071 = vmatmul.msk.bf16.gmra.mxu1 %vm393_vm0, %v6003_v18  ;;  %5076 = vmatmul.msk.bf16.gmra.mxu2 %vm393_vm0, %v6008_v19  ;;  %v1298_v18 = vsel %vm1295_vm1, %v1296_v12, %v1297_v13  ;;  %v1762_v19 = vrot.slane %v6066_v14, 1  ;;  %v6127_v12 = vld [vmem:[%s7608_s1 + $0xb0] sm:$0xff] }
  0x2d   : > { %3394 = vmatpush.bf16.msra.mxu2 %v6150_v41  ;;  %2933 = vmatpush.bf16.msra.mxu1 %v6128_v44  ;;  %v6022_v41 = vld [vmem:[%s6429_s30 + $0x18] sm:$0xff]  ;;  %v2249_v44 = vshll.u32 %v6088_v40, 16 }
  0x2e   : > { %5081 = vmatmul.msk.bf16.gmra.mxu3 %vm393_vm0, %v6013_v21  ;;  %4451 = vmatpush.bf16.msra.mxu0 %v6194_v45  ;;  %v6087_v21 = vld [vmem:[%s6429_s30 + $0x18] sm:$0xff]  ;;  %v1763_v23 = vsel %vm1295_vm1, %v1760_v53, %v1762_v19  ;;  %v743_v45 = vshrl.u32 %v6021_v22, 16  ;;  %v747_v46 = vshll.u32 %v6022_v41, 16  ;;  %v6068_v53 = vld [vmem:[%s6429_s30 + $0x30] sm:$0xff]  ;;  %v751_v0 = vshrl.u32 %v6022_v41, 16 }
  0x2f   : > { %5066 = vmatmul.msk.bf16.gmra.mxu0 %vm393_vm0, %v5998_v20  ;;  %3989 = vmatpush.bf16.msra.mxu3 %v6172_v43  ;;  %v2235_v20 = vsel %vm2218_vm3, %v2226_v15, %v2234_v16  ;;  %v2237_v24 = vshrl.u32 %v6087_v21, 16  ;;  %v2246_v43 = vshrl.u32 %v6088_v40, 16  ;;  %v1766_v57 = vrot.slane %v6068_v53, 1 }
  0x30   : > { %v1304_v15 = vsel %vm1295_vm1, %v1301_v52, %v1303_v9 }
  0x31   : > { %v2239_v29 = vrot.slane %v2237_v24, 1  ;;  %v2248_v48 = vrot.slane %v2246_v43, 1  ;;  %3395 = vmatpush.bf16.msra.mxu2 %v6149_v5  ;;  %2934 = vmatpush.bf16.msra.mxu1 %v6127_v12 }
  0x33   : > { %3990 = vmatpush.bf16.msra.mxu3 %v6171_v6 }
  0x3c   : > { %5072 = vmatmul.msk.bf16.gmra.mxu1 %vm393_vm0, %v6004_v25  ;;  %5077 = vmatmul.msk.bf16.gmra.mxu2 %vm393_vm0, %v6009_v26  ;;  %v2240_v25 = vshll.u32 %v6087_v21, 16  ;;  %v735_v26 = vshrl.u32 %v6020_v56, 16 }
  0x3e   : > { %5082 = vmatmul.msk.bf16.gmra.mxu3 %vm393_vm0, %v6014_v28  ;;  %v6043_v28 = vld [vmem:[%s6429_s30 + $0x10] sm:$0xff]  ;;  %v2242_v30 = vrot.slane %v2240_v25, 2  ;;  %v737_v31 = vor.u32 %v735_v26, %v733_v11 }
  0x3f   : > { %5067 = vmatmul.msk.bf16.gmra.mxu0 %vm393_vm0, %v5999_v27  ;;  %v739_v27 = vshll.u32 %v6021_v22, 16  ;;  %v1299_v33 = vrot.slane %v6043_v28, 1  ;;  %v6193_v22 = vld [vmem:[%s7608_s1 + $0x110] sm:$0xff] }
  0x40   : > { %v2243_v35 = vor.u32 %v2242_v30, %v2239_v29  ;;  %4452 = vmatpush.bf16.msra.mxu0 %v6193_v22  ;;  %v6046_v29 = vld [vmem:[%s6429_s30 + $0x28] sm:$0xff] }
  0x41   : > { %v741_v32 = vrot.slane %v739_v27, 1  ;;  %v1302_v56 = vsel %vm1295_vm1, %v1299_v33, %v1301_v52  ;;  %v759_v27 = vshrl.u32 %v6023_v60, 16 }
  0x42   : > { %v2244_v39 = vsel %vm2218_vm3, %v2234_v16, %v2243_v35  ;;  %v1768_v16 = vrot.slane %v6069_v10, 1 }
  0x44   : > { %v1769_v21 = vsel %vm1295_vm1, %v1766_v57, %v1768_v16 }
  0x4c   : > { %5073 = vmatmul.msk.bf16.gmra.mxu1 %vm393_vm0, %v6005_v36  ;;  %5078 = vmatmul.msk.bf16.gmra.mxu2 %vm393_vm0, %v6010_v37  ;;  %v742_v36 = vsel %vm722_vm2, %v737_v31, %v741_v32  ;;  %v1300_v37 = vsel %vm1295_vm1, %v1297_v13, %v1299_v33 }
  0x4e   : > { %5407 = vmatmul.msk.bf16.vlgmr.msrb.gmra.mxu3 %vm393_vm0, %v1759_v42 }
  0x4f   : > { %5068 = vmatmul.msk.bf16.gmra.mxu0 %vm393_vm0, %v6000_v38  ;;  %v1764_v38 = vrot.slane %v6067_v34, 1  ;;  %v761_v34 = vor.u32 %v759_v27, %v757_v8 }
  0x51   : > { %v1765_v42 = vsel %vm1295_vm1, %v1762_v19, %v1764_v38  ;;  %v1767_v61 = vsel %vm1295_vm1, %v1764_v38, %v1766_v57  ;;  %v6090_v19 = vld [vmem:[%s6429_s30 + $0x30] sm:$0xff] }
  0x52   : > { %v2267_v24 = vshll.u32 %v6090_v19, 16 }
  0x5c   : > { %5074 = vmatmul.msk.bf16.gmra.mxu1 %vm393_vm0, %v6006_v49  ;;  %5079 = vmatmul.msk.bf16.gmra.mxu2 %vm393_vm0, %v6011_v50  ;;  %v2251_v49 = vrot.slane %v2249_v44, 2  ;;  %v745_v50 = vor.u32 %v743_v45, %v741_v32  ;;  %v2269_v32 = vrot.slane %v2267_v24, 2 }
  0x5e   : > { %5408 = vmatmul.msk.bf16.gmra.mxu3 %vm393_vm0, %v1761_v59  ;;  %v2252_v54 = vor.u32 %v2251_v49, %v2248_v48  ;;  %v6089_v59 = vld [vmem:[%s6429_s30 + $0x28] sm:$0xff]  ;;  %v6025_v48 = vld [vmem:[%s6429_s30 + $0x30] sm:$0xff] }
  0x5f   : > { %5069 = vmatmul.msk.bf16.gmra.mxu0 %vm393_vm0, %v6001_v51  ;;  %v749_v51 = vrot.slane %v747_v46, 1  ;;  %v2255_v62 = vshrl.u32 %v6089_v59, 16  ;;  %v2258_v63 = vshll.u32 %v6089_v59, 16  ;;  %v6091_v46 = vld [vmem:[%s6429_s30 + $0x38] sm:$0xff] }
  0x60   : > { %v2253_v58 = vsel %vm2218_vm3, %v2243_v35, %v2252_v54 }
  0x61   : > { %v750_v55 = vsel %vm722_vm2, %v745_v50, %v749_v51  ;;  %v2257_v3 = vrot.slane %v2255_v62, 1  ;;  %v2260_v4 = vrot.slane %v2258_v63, 2  ;;  %v753_v7 = vor.u32 %v751_v0, %v749_v51  ;;  %v6071_v0 = vld [vmem:[%s6429_s30 + $0x48] sm:$0xff] }
  0x62   : > { %v2273_v50 = vshrl.u32 %v6091_v46, 16  ;;  %v2276_v51 = vshll.u32 %v6091_v46, 16  ;;  %v1772_v6 = vrot.slane %v6071_v0, 1 }
  0x63   : > { %v2261_v11 = vor.u32 %v2260_v4, %v2257_v3  ;;  %v758_v14 = vsel %vm722_vm2, %v753_v7, %v757_v8 }
  0x64   : > { %v2278_v59 = vrot.slane %v2276_v51, 2 }
  0x6c   : > { %5179 = vmatmul.msk.bf16.vlgmr.msrb.gmra.mxu1 %vm393_vm0, %v734_v17  ;;  %5293 = vmatmul.msk.bf16.vlgmr.msrb.gmra.mxu2 %vm393_vm0, %v1298_v18  ;;  %v2262_v18 = vsel %vm2218_vm3, %v2252_v54, %v2261_v11 }
  0x6e   : > { %5409 = vmatmul.msk.bf16.gmra.mxu3 %vm393_vm0, %v1763_v23  ;;  %v2264_v23 = vshrl.u32 %v6090_v19, 16  ;;  %v775_v19 = vshrl.u32 %v6025_v48, 16 }
  0x6f   : > { %5521 = vmatmul.msk.bf16.vlgmr.msrb.gmra.mxu0 %vm393_vm0, %v2235_v20  ;;  %v6024_v20 = vld [vmem:[%s6429_s30 + $0x28] sm:$0xff] }
  0x70   : > { %v763_v28 = vshll.u32 %v6024_v20, 16  ;;  %v2266_v31 = vrot.slane %v2264_v23, 1  ;;  %v767_v54 = vshrl.u32 %v6024_v20, 16 }
  0x72   : > { %v765_v35 = vrot.slane %v763_v28, 1  ;;  %v2270_v38 = vor.u32 %v2269_v32, %v2266_v31  ;;  %v6072_v32 = vld [vmem:[%s6429_s30 + $0x50] sm:$0xff] }
  0x74   : > { %v766_v41 = vsel %vm722_vm2, %v761_v34, %v765_v35  ;;  %v2271_v45 = vsel %vm2218_vm3, %v2261_v11, %v2270_v38  ;;  %v6026_v11 = vld [vmem:[%s6429_s30 + $0x38] sm:$0xff] }
  0x75   : > { %v779_v20 = vshll.u32 %v6026_v11, 16 }
  0x7c   : > { %5180 = vmatmul.msk.bf16.gmra.mxu1 %vm393_vm0, %v742_v36  ;;  %5294 = vmatmul.msk.bf16.gmra.mxu2 %vm393_vm0, %v1300_v37  ;;  %v1305_v36 = vrot.slane %v6046_v29, 1  ;;  %v6070_v37 = vld [vmem:[%s6429_s30 + $0x40] sm:$0xff]  ;;  %v781_v29 = vrot.slane %v779_v20, 1 }
  0x7d   : > { %v1770_v43 = vrot.slane %v6070_v37, 1 }
  0x7e   : > { %5410 = vmatmul.msk.bf16.gmra.mxu3 %vm393_vm0, %v1765_v42  ;;  %v1306_v42 = vsel %vm1295_vm1, %v1303_v9, %v1305_v36  ;;  %v6092_v9 = vld [vmem:[%s6429_s30 + $0x40] sm:$0xff] }
  0x7f   : > { %5522 = vmatmul.msk.bf16.gmra.mxu0 %vm393_vm0, %v2244_v39  ;;  %v1771_v49 = vsel %vm1295_vm1, %v1768_v16, %v1770_v43  ;;  %v1773_v12 = vsel %vm1295_vm1, %v1770_v43, %v1772_v6 }
  0x8c   : > { %5181 = vmatmul.msk.bf16.gmra.mxu1 %vm393_vm0, %v750_v55  ;;  %5295 = vmatmul.msk.bf16.gmra.mxu2 %vm393_vm0, %v1302_v56  ;;  %v771_v55 = vshll.u32 %v6025_v48, 16  ;;  %v6047_v56 = vld [vmem:[%s6429_s30 + $0x30] sm:$0xff]  ;;  %v6027_v48 = vld [vmem:[%s6429_s30 + $0x40] sm:$0xff] }
  0x8d   : > { %v1307_v63 = vrot.slane %v6047_v56, 1  ;;  %v783_v56 = vshrl.u32 %v6026_v11, 16 }
  0x8e   : > { %5411 = vmatmul.msk.bf16.gmra.mxu3 %vm393_vm0, %v1767_v61  ;;  %v769_v61 = vor.u32 %v767_v54, %v765_v35  ;;  %v773_v62 = vrot.slane %v771_v55, 1 }
  0x8f   : > { %5523 = vmatmul.msk.bf16.gmra.mxu0 %vm393_vm0, %v2253_v58  ;;  %v2275_v58 = vrot.slane %v2273_v50, 1  ;;  %v1308_v5 = vsel %vm1295_vm1, %v1305_v36, %v1307_v63 }
  0x90   : > { %v774_v4 = vsel %vm722_vm2, %v769_v61, %v773_v62  ;;  %v777_v28 = vor.u32 %v775_v19, %v773_v62 }
  0x91   : > { %v2279_v1 = vor.u32 %v2278_v59, %v2275_v58  ;;  %v787_v58 = vshll.u32 %v6027_v48, 16  ;;  %v6049_v59 = vld [vmem:[%s6429_s30 + $0x40] sm:$0xff] }
  0x92   : > { %v782_v37 = vsel %vm722_vm2, %v777_v28, %v781_v29  ;;  %v6028_v28 = vld [vmem:[%s6429_s30 + $0x48] sm:$0xff] }
  0x93   : > { %v2280_v8 = vsel %vm2218_vm3, %v2270_v38, %v2279_v1 }
  0x99   : > { %v6589_v13 = vpop.f32.mrf.mxu1 }
  0x9c   : > { %v6593_v17 = vpop.f32.mrf.mxu0  ;;  %5182 = vmatmul.msk.bf16.gmra.mxu1 %vm393_vm0, %v758_v14  ;;  %5296 = vmatmul.msk.bf16.gmra.mxu2 %vm393_vm0, %v1304_v15  ;;  %v2282_v14 = vshrl.u32 %v6092_v9, 16  ;;  %v2285_v15 = vshll.u32 %v6092_v9, 16 }
  0x9e   : > { %5412 = vmatmul.msk.bf16.gmra.mxu3 %vm393_vm0, %v1769_v21  ;;  %v6048_v21 = vld [vmem:[%s6429_s30 + $0x38] sm:$0xff]  ;;  %v2284_v23 = vrot.slane %v2282_v14, 1  ;;  %v2287_v24 = vrot.slane %v2285_v15, 2 }
  0x9f   : > { %5524 = vmatmul.msk.bf16.gmra.mxu0 %vm393_vm0, %v2262_v18  ;;  %v6605_v25 = vpop.f32.mrf.mxu2  ;;  %v1309_v31 = vrot.slane %v6048_v21, 1  ;;  %v6094_v21 = vld [vmem:[%s6429_s30 + $0x50] sm:$0xff] }
  0xa0   : > { %v2288_v34 = vor.u32 %v2287_v24, %v2284_v23  ;;  %v6148_v24 = vld [vmem:[%s7608_s1 + $0xc8] sm:$0xff] }
  0xa1   : > { %v6608_v26 = vpop.f32.mrf.mxu1  ;;  %v6613_v33 = vpop.f32.mrf.mxu3  ;;  %v1310_v38 = vsel %vm1295_vm1, %v1307_v63, %v1309_v31  ;;  %3396 = vmatpush.bf16.msra.mxu2 %v6148_v24 }
  0xa2   : > { %v2289_v43 = vsel %vm2218_vm3, %v2279_v1, %v2288_v34  ;;  %v785_v1 = vor.u32 %v783_v56, %v781_v29  ;;  %v6126_v56 = vld [vmem:[%s7608_s1 + $0xa8] sm:$0xff] }
  0xa3   : > { %2935 = vmatpush.bf16.msra.mxu1 %v6126_v56  ;;  %v799_v56 = vshrl.u32 %v6028_v28, 16 }
  0xa4   : > { %v6611_v30 = vpop.f32.mrf.mxu0 }
  0xa7   : > { %v6616_v39 = vpop.f32.mrf.mxu2 }
  0xa9   : > { %v6618_v40 = vpop.f32.mrf.mxu1  ;;  %v6626_v47 = vpop.f32.mrf.mxu3 }
  0xac   : > { %v6622_v44 = vpop.f32.mrf.mxu0  ;;  %5183 = vmatmul.msk.bf16.gmra.mxu1 %vm393_vm0, %v766_v41  ;;  %5297 = vmatmul.msk.bf16.gmra.mxu2 %vm393_vm0, %v1306_v42  ;;  %v1774_v41 = vrot.slane %v6072_v32, 1  ;;  %v2300_v32 = vshrl.u32 %v6094_v21, 16 }
  0xae   : > { %5413 = vmatmul.msk.bf16.gmra.mxu3 %vm393_vm0, %v1771_v49  ;;  %v1775_v49 = vsel %vm1295_vm1, %v1772_v6, %v1774_v41  ;;  %v6073_v6 = vld [vmem:[%s6429_s30 + $0x58] sm:$0xff] }
  0xaf   : > { %5525 = vmatmul.msk.bf16.gmra.mxu0 %vm393_vm0, %v2271_v45  ;;  %v6633_v52 = vpop.f32.mrf.mxu2  ;;  %v6093_v45 = vld [vmem:[%s6429_s30 + $0x48] sm:$0xff]  ;;  %v1776_v15 = vrot.slane %v6073_v6, 1 }
  0xb0   : > { %v2291_v50 = vshrl.u32 %v6093_v45, 16  ;;  %v2294_v51 = vshll.u32 %v6093_v45, 16  ;;  %v795_v45 = vshll.u32 %v6028_v28, 16 }
  0xb1   : > { %v6636_v53 = vpop.f32.mrf.mxu1  ;;  %v6641_v60 = vpop.f32.mrf.mxu3  ;;  %v1777_v29 = vsel %vm1295_vm1, %v1774_v41, %v1776_v15  ;;  %v2302_v41 = vrot.slane %v2300_v32, 1  ;;  %v6095_v32 = vld [vmem:[%s6429_s30 + $0x58] sm:$0xff] }
  0xb2   : > { %v2293_v62 = vrot.slane %v2291_v50, 1  ;;  %v2296_v63 = vrot.slane %v2294_v51, 2 }
  0xb4   : > { %v6639_v57 = vpop.f32.mrf.mxu0 }
  0xb7   : > { %v6644_v2 = vpop.f32.mrf.mxu2 }
  0xb9   : > { %v6646_v3 = vpop.f32.mrf.mxu1  ;;  %v6654_v10 = vpop.f32.mrf.mxu3 }
  0xba   : > { %7612 = vst [vmem:[#allocation3_spill] sm:$0xff] %v6654_v10 }
  0xbc   : > { %v6650_v7 = vpop.f32.mrf.mxu0  ;;  %5184 = vmatmul.msk.bf16.gmra.mxu1 %vm393_vm0, %v774_v4  ;;  %5298 = vmatmul.msk.bf16.gmra.mxu2 %vm393_vm0, %v1308_v5  ;;  %v789_v4 = vrot.slane %v787_v58, 1  ;;  %v1311_v5 = vrot.slane %v6049_v59, 1  ;;  %v6192_v58 = vld [vmem:[%s7608_s1 + $0x108] sm:$0xff] }
  0xbd   : > { %4453 = vmatpush.bf16.msra.mxu0 %v6192_v58 }
  0xbe   : > { %5414 = vmatmul.msk.bf16.gmra.mxu3 %vm393_vm0, %v1773_v12  ;;  %v790_v11 = vsel %vm722_vm2, %v785_v1, %v789_v4  ;;  %v1312_v14 = vsel %vm1295_vm1, %v1309_v31, %v1311_v5  ;;  %v6170_v31 = vld [vmem:[%s7608_s1 + $0xe8] sm:$0xff]  ;;  %v6074_v1 = vld [vmem:[%s6429_s30 + $0x60] sm:$0xff] }
  0xbf   : > { %5526 = vmatmul.msk.bf16.gmra.mxu0 %vm393_vm0, %v2280_v8  ;;  %v6661_v16 = vpop.f32.mrf.mxu2  ;;  %v2297_v8 = vor.u32 %v2296_v63, %v2293_v62  ;;  %3991 = vmatpush.bf16.msra.mxu3 %v6170_v31  ;;  %v797_v62 = vrot.slane %v795_v45, 1  ;;  %v1778_v24 = vrot.slane %v6074_v1, 1 }
  0xc1   : > { %v6664_v18 = vpop.f32.mrf.mxu1  ;;  %v6669_v27 = vpop.f32.mrf.mxu3  ;;  %v2298_v20 = vsel %vm2218_vm3, %v2288_v34, %v2297_v8  ;;  %v2303_v34 = vshll.u32 %v6094_v21, 16 }
  0xc2   : > { %7613 = vst [vmem:[#allocation4_spill] sm:$0xff] %v6669_v27 }
  0xc3   : > { %v2305_v51 = vrot.slane %v2303_v34, 2 }
  0xc4   : > { %v6667_v22 = vpop.f32.mrf.mxu0 }
  0xc5   : > { %v2306_v6 = vor.u32 %v2305_v51, %v2302_v41 }
  0xc7   : > { %v6672_v35 = vpop.f32.mrf.mxu2  ;;  %v2307_v31 = vsel %vm2218_vm3, %v2297_v8, %v2306_v6 }
  0xc9   : > { %v6674_v36 = vpop.f32.mrf.mxu1  ;;  %v6682_v46 = vpop.f32.mrf.mxu3 }
  0xca   : > { %7614 = vst [vmem:[#allocation5_spill] sm:$0xff] %v6682_v46 }
  0xcc   : > { %v6678_v42 = vpop.f32.mrf.mxu0  ;;  %5185 = vmatmul.msk.bf16.gmra.mxu1 %vm393_vm0, %v782_v37  ;;  %5299 = vmatmul.msk.bf16.gmra.mxu2 %vm393_vm0, %v1310_v38 }
  0xce   : > { %5415 = vmatmul.msk.bf16.gmra.mxu3 %vm393_vm0, %v1775_v49  ;;  %v6050_v49 = vld [vmem:[%s6429_s30 + $0x48] sm:$0xff] }
  0xcf   : > { %5527 = vmatmul.msk.bf16.gmra.mxu0 %vm393_vm0, %v2289_v43  ;;  %v6689_v54 = vpop.f32.mrf.mxu2  ;;  %v791_v43 = vshrl.u32 %v6027_v48, 16  ;;  %v1313_v63 = vrot.slane %v6050_v49, 1  ;;  %v2312_v49 = vshll.u32 %v6095_v32, 16 }
  0xd1   : > { %v6692_v55 = vpop.f32.mrf.mxu1  ;;  %v6697_v0 = vpop.f32.mrf.mxu3  ;;  %v793_v48 = vor.u32 %v791_v43, %v789_v4  ;;  %v1314_v21 = vsel %vm1295_vm1, %v1311_v5, %v1313_v63  ;;  %v6029_v4 = vld [vmem:[%s6429_s30 + $0x50] sm:$0xff]  ;;  %v1779_v43 = vsel %vm1295_vm1, %v1776_v15, %v1778_v24  ;;  %v2309_v5 = vshrl.u32 %v6095_v32, 16 }
  0xd2   : > { %v803_v58 = vshll.u32 %v6029_v4, 16 }
  0xd4   : > { %v6695_v61 = vpop.f32.mrf.mxu0 }
  0xd7   : > { %v6700_v9 = vpop.f32.mrf.mxu2 }
  0xd9   : > { %v6702_v12 = vpop.f32.mrf.mxu1  ;;  %v6710_v23 = vpop.f32.mrf.mxu3 }
  0xdc   : > { %v6706_v19 = vpop.f32.mrf.mxu0  ;;  %5186 = vmatmul.msk.bf16.gmra.mxu1 %vm393_vm0, %v790_v11  ;;  %5300 = vmatmul.msk.bf16.gmra.mxu2 %vm393_vm0, %v1312_v14 }
  0xde   : > { %5416 = vmatmul.msk.bf16.gmra.mxu3 %vm393_vm0, %v1777_v29 }
  0xdf   : > { %5528 = vmatmul.msk.bf16.gmra.mxu0 %vm393_vm0, %v2298_v20  ;;  %v6723_v37 = vpop.f32.mrf.mxu2  ;;  %v798_v20 = vsel %vm722_vm2, %v793_v48, %v797_v62  ;;  %v6051_v48 = vld [vmem:[%s6429_s30 + $0x50] sm:$0xff] }
  0xe0   : > { %v1315_v32 = vrot.slane %v6051_v48, 1 }
  0xe1   : > { %v6726_v38 = vpop.f32.mrf.mxu1  ;;  %v6737_v59 = vpop.f32.mrf.mxu3 }
  0xe4   : > { %v6729_v50 = vpop.f32.mrf.mxu0 }
  0xe7   : > { %v6740_v11 = vpop.f32.mrf.mxu2 }
  0xe9   : > { %v958_v14 = vpop.f32.mrf.mxu1  ;;  %v6746_v34 = vpop.f32.mrf.mxu3 }
  0xea   : > { %v1084_v45 = vadd.f32 %v958_v14, %v6593_v17  ;;  %v801_v17 = vor.u32 %v799_v56, %v797_v62  ;;  %v805_v14 = vrot.slane %v803_v58, 1  ;;  %v6096_v56 = vld [vmem:[%s6429_s30 + $0x60] sm:$0xff] }
  0xeb   : > { %v2321_v48 = vshll.u32 %v6096_v56, 16 }
  0xec   : > { %v2476_v29 = vpop.f32.mrf.mxu0  ;;  %5187 = vmatmul.msk.bf16.gmra.mxu1 %vm393_vm0, %v798_v20  ;;  %5301 = vmatmul.msk.bf16.gmra.mxu2 %vm393_vm0, %v1314_v21  ;;  %v2311_v21 = vrot.slane %v2309_v5, 1  ;;  %v1316_v5 = vsel %vm1295_vm1, %v1313_v63, %v1315_v32 }
  0xee   : > { %5417 = vmatmul.msk.bf16.gmra.mxu3 %vm393_vm0, %v1779_v43 }
  0xef   : > { %5529 = vmatmul.msk.bf16.gmra.mxu0 %vm393_vm0, %v2307_v31  ;;  %v1420_v41 = vpop.f32.mrf.mxu2  ;;  %v2314_v31 = vrot.slane %v2312_v49, 2 }
  0xf0   : > { %v1546_v8 = vadd.f32 %v1420_v41, %v1084_v45  ;;  %v6075_v45 = vld [vmem:[%s6429_s30 + $0x68] sm:$0xff] }
  0xf1   : > { %v960_v51 = vpop.f32.mrf.mxu1  ;;  %v6757_v46 = vpop.f32.mrf.mxu3  ;;  %v2315_v41 = vor.u32 %v2314_v31, %v2311_v21  ;;  %v1780_v49 = vrot.slane %v6075_v45, 1  ;;  %v807_v31 = vshrl.u32 %v6029_v4, 16  ;;  %v6052_v45 = vld [vmem:[%s6429_s30 + $0x58] sm:$0xff] }
  0xf2   : > { %v2007_v1 = vadd.f32 %v6697_v0, %v1546_v8  ;;  %v1085_v43 = vadd.f32 %v960_v51, %v6611_v30  ;;  %v806_v0 = vsel %vm722_vm2, %v801_v17, %v805_v14  ;;  %v6030_v51 = vld [vmem:[%s6429_s30 + $0x58] sm:$0xff] }
  0xf3   : > { %v2316_v62 = vsel %vm2218_vm3, %v2306_v6, %v2315_v41  ;;  %v1781_v63 = vsel %vm1295_vm1, %v1778_v24, %v1780_v49  ;;  %v811_v17 = vshll.u32 %v6030_v51, 16 }
  0xf4   : > { %v2478_v20 = vpop.f32.mrf.mxu0  ;;  %v6759_v15 = vadd.f32 %v2476_v29, %v2007_v1 }
  0xf7   : > { %v1422_v28 = vpop.f32.mrf.mxu2 }
  0xf8   : > { %v1547_v27 = vadd.f32 %v1422_v28, %v1085_v43 }
  0xf9   : > { %v963_v10 = vpop.f32.mrf.mxu1  ;;  %v6768_v58 = vpop.f32.mrf.mxu3 }
  0xfa   : > { %v2008_v29 = vadd.f32 %v6710_v23, %v1547_v27  ;;  %v1086_v27 = vadd.f32 %v963_v10, %v6622_v44  ;;  %v2318_v23 = vshrl.u32 %v6096_v56, 16  ;;  %v809_v44 = vor.u32 %v807_v31, %v805_v14  ;;  %v6097_v31 = vld [vmem:[%s6429_s30 + $0x68] sm:$0xff] }
  0xfb   : > { %v813_v10 = vrot.slane %v811_v17, 1 }
  0xfc   : > { %v2481_v8 = vpop.f32.mrf.mxu0  ;;  %5188 = vmatmul.msk.bf16.gmra.mxu1 %vm393_vm0, %v806_v0  ;;  %5302 = vmatmul.msk.bf16.gmra.mxu2 %vm393_vm0, %v1316_v5  ;;  %v6772_v30 = vadd.f32 %v2478_v20, %v2008_v29  ;;  %v2320_v28 = vrot.slane %v2318_v23, 1  ;;  %v2323_v0 = vrot.slane %v2321_v48, 2  ;;  %v1317_v29 = vrot.slane %v6052_v45, 1 }
  0xfd   : > { %v2327_v45 = vshrl.u32 %v6097_v31, 16 }
  0xfe   : > { %5418 = vmatmul.msk.bf16.gmra.mxu3 %vm393_vm0, %v1781_v63  ;;  %v2324_v63 = vor.u32 %v2323_v0, %v2320_v28  ;;  %v1318_v23 = vsel %vm1295_vm1, %v1315_v32, %v1317_v29 }
  0xff   : > { %5530 = vmatmul.msk.bf16.gmra.mxu0 %vm393_vm0, %v2316_v62  ;;  %v1425_v6 = vpop.f32.mrf.mxu2  ;;  %v6076_v62 = vld [vmem:[%s6429_s30 + $0x70] sm:$0xff] }
 0x100   : > { %v1548_v1 = vadd.f32 %v1425_v6, %v1086_v27  ;;  %v1782_v48 = vrot.slane %v6076_v62, 1  ;;  %v2325_v14 = vsel %vm2218_vm3, %v2315_v41, %v2324_v63 }
 0x101   : > { %v965_v21 = vpop.f32.mrf.mxu1  ;;  %v6781_v5 = vpop.f32.mrf.mxu3 }
 0x102   : > { %v2009_v20 = vadd.f32 %v6737_v59, %v1548_v1  ;;  %v1087_v56 = vadd.f32 %v965_v21, %v6639_v57  ;;  %v814_v59 = vsel %vm722_vm2, %v809_v44, %v813_v10  ;;  %v6031_v21 = vld [vmem:[%s6429_s30 + $0x60] sm:$0xff]  ;;  %v1783_v32 = vsel %vm1295_vm1, %v1780_v49, %v1782_v48 }
 0x103   : > { %v815_v44 = vshrl.u32 %v6030_v51, 16  ;;  %v819_v62 = vshll.u32 %v6031_v21, 16 }
 0x104   : > { %v2483_v43 = vpop.f32.mrf.mxu0  ;;  %v6783_v24 = vadd.f32 %v2481_v8, %v2009_v20  ;;  %v2330_v20 = vshll.u32 %v6097_v31, 16 }
 0x107   : > { %v1427_v4 = vpop.f32.mrf.mxu2 }
 0x108   : > { %v1549_v27 = vadd.f32 %v1427_v4, %v1087_v56  ;;  %v6053_v56 = vld [vmem:[%s6429_s30 + $0x60] sm:$0xff] }
 0x109   : > { %v968_v6 = vpop.f32.mrf.mxu1  ;;  %v6792_v17 = vpop.f32.mrf.mxu3 }
 0x10a   : > { %v2010_v8 = vadd.f32 %v6746_v34, %v1549_v27  ;;  %v1088_v34 = vadd.f32 %v968_v6, %v6650_v7  ;;  %v2329_v27 = vrot.slane %v2327_v45, 1  ;;  %v817_v7 = vor.u32 %v815_v44, %v813_v10  ;;  %v6098_v44 = vld [vmem:[%s6429_s30 + $0x70] sm:$0xff] }
 0x10b   : > { %v821_v6 = vrot.slane %v819_v62, 1 }
 0x10c   : > { %v2486_v1 = vpop.f32.mrf.mxu0  ;;  %5189 = vmatmul.msk.bf16.gmra.mxu1 %vm393_vm0, %v814_v59  ;;  %5303 = vmatmul.msk.bf16.gmra.mxu2 %vm393_vm0, %v1318_v23  ;;  %v6796_v57 = vadd.f32 %v2483_v43, %v2010_v8  ;;  %v2332_v59 = vrot.slane %v2330_v20, 2  ;;  %v1319_v8 = vrot.slane %v6053_v56, 1  ;;  %v2336_v56 = vshrl.u32 %v6098_v44, 16 }
 0x10d   : > { %v822_v45 = vsel %vm722_vm2, %v817_v7, %v821_v6  ;;  %v823_v7 = vshrl.u32 %v6031_v21, 16 }
 0x10e   : > { %5419 = vmatmul.msk.bf16.gmra.mxu3 %vm393_vm0, %v1783_v32  ;;  %v2333_v51 = vor.u32 %v2332_v59, %v2329_v27  ;;  %v1320_v20 = vsel %vm1295_vm1, %v1317_v29, %v1319_v8  ;;  %v6827_v29 = vld [vmem:[%s6429_s30 + $0x68] sm:$0xff] }
 0x10f   : > { %5531 = vmatmul.msk.bf16.gmra.mxu0 %vm393_vm0, %v2325_v14  ;;  %v1430_v41 = vpop.f32.mrf.mxu2  ;;  %v6810_v14 = vld [vmem:[%s6429_s30 + $0x78] sm:$0xff] }
 0x110   : > { %v1550_v28 = vadd.f32 %v1430_v41, %v1088_v34 }
 0x111   : > { %v970_v0 = vpop.f32.mrf.mxu1  ;;  %v6805_v23 = vpop.f32.mrf.mxu3 }
 0x112   : > { %v2011_v43 = vadd.f32 %v6757_v46, %v1550_v28  ;;  %v1089_v31 = vadd.f32 %v970_v0, %v6667_v22  ;;  %v2334_v28 = vsel %vm2218_vm3, %v2324_v63, %v2333_v51  ;;  %v2339_v63 = vshll.u32 %v6098_v44, 16 }
 0x114   : > { %v2488_v4 = vpop.f32.mrf.mxu0  ;;  %v6807_v49 = vadd.f32 %v2486_v1, %v2011_v43  ;;  %v1784_v1 = vrot.slane %v6810_v14, 1  ;;  %v6834_v14 = vld [vmem:[%s6429_s30 + $0x68] sm:$0xff] }
 0x116   : > { %v1785_v0 = vsel %vm1295_vm1, %v1782_v48, %v1784_v1  ;;  %v2341_v48 = vrot.slane %v2339_v63, 2 }
 0x117   : > { %v1432_v32 = vpop.f32.mrf.mxu2 }
 0x118   : > { %v1551_v34 = vadd.f32 %v1432_v32, %v1089_v31 }
 0x119   : > { %v973_v46 = vpop.f32.mrf.mxu1  ;;  %v6819_v62 = vpop.f32.mrf.mxu3 }
 0x11a   : > { %v2012_v41 = vadd.f32 %v6768_v58, %v1551_v34  ;;  %v1090_v58 = vadd.f32 %v973_v46, %v6678_v42  ;;  %v2338_v34 = vrot.slane %v2336_v56, 1  ;;  %v6147_v42 = vld [vmem:[%s7608_s1 + $0xc0] sm:$0xff] }
 0x11b   : > { %v6169_v46 = vld [vmem:[%s7608_s1 + $0xe0] sm:$0xff]  ;;  %3397 = vmatpush.bf16.msra.mxu2 %v6147_v42 }
 0x11c   : > { %v2491_v10 = vpop.f32.mrf.mxu0  ;;  %5190 = vmatmul.msk.bf16.gmra.mxu1 %vm393_vm0, %v822_v45  ;;  %5304 = vmatmul.msk.bf16.gmra.mxu2 %vm393_vm0, %v1320_v20  ;;  %v6823_v22 = vadd.f32 %v2488_v4, %v2012_v41  ;;  %v827_v4 = vshll.u32 %v6827_v29, 16  ;;  %v825_v20 = vor.u32 %v823_v7, %v821_v6  ;;  %v1321_v41 = vrot.slane %v6834_v14, 1  ;;  %v6099_v14 = vld [vmem:[%s6429_s30 + $0x78] sm:$0xff] }
 0x11d   : > { %3992 = vmatpush.bf16.msra.mxu3 %v6169_v46  ;;  %v2348_v42 = vshll.u32 %v6099_v14, 16 }
 0x11e   : > { %5420 = vmatmul.msk.bf16.gmra.mxu3 %vm393_vm0, %v1785_v0  ;;  %v2342_v0 = vor.u32 %v2341_v48, %v2338_v34  ;;  %v2345_v48 = vshrl.u32 %v6099_v14, 16 }
 0x11f   : > { %5532 = vmatmul.msk.bf16.gmra.mxu0 %vm393_vm0, %v2334_v28  ;;  %v1435_v43 = vpop.f32.mrf.mxu2  ;;  %v6849_v28 = vld [vmem:[%s6429_s30 + $0x80] sm:$0xff] }
 0x120   : > { %v1552_v27 = vadd.f32 %v1435_v43, %v1090_v58 }
 0x121   : > { %v975_v59 = vpop.f32.mrf.mxu1  ;;  %v6843_v45 = vpop.f32.mrf.mxu3 }
 0x122   : > { %v2013_v31 = vadd.f32 %v6781_v5, %v1552_v27  ;;  %v829_v5 = vrot.slane %v827_v4, 1  ;;  %v1091_v44 = vadd.f32 %v975_v59, %v6695_v61  ;;  %v1322_v27 = vsel %vm1295_vm1, %v1319_v8, %v1321_v41  ;;  %v6125_v61 = vld [vmem:[%s7608_s1 + $0xa0] sm:$0xff] }
 0x123   : > { %v2343_v4 = vsel %vm2218_vm3, %v2333_v51, %v2342_v0  ;;  %2936 = vmatpush.bf16.msra.mxu1 %v6125_v61  ;;  %v6191_v51 = vld [vmem:[%s7608_s1 + $0x100] sm:$0xff]  ;;  %v6079_v61 = vld [vmem:[%s6429_s30 + $0x88] sm:$0xff] }
 0x124   : > { %v2493_v32 = vpop.f32.mrf.mxu0  ;;  %v6845_v21 = vadd.f32 %v2491_v10, %v2013_v31  ;;  %v830_v43 = vsel %vm722_vm2, %v825_v20, %v829_v5  ;;  %v1786_v10 = vrot.slane %v6849_v28, 1  ;;  %4454 = vmatpush.bf16.msra.mxu0 %v6191_v51  ;;  %v831_v28 = vshrl.u32 %v6827_v29, 16 }
 0x126   : > { %v1787_v8 = vsel %vm1295_vm1, %v1784_v1, %v1786_v10  ;;  %v6055_v1 = vld [vmem:[%s6429_s30 + $0x70] sm:$0xff] }
 0x127   : > { %v1437_v58 = vpop.f32.mrf.mxu2  ;;  %v1323_v14 = vrot.slane %v6055_v1, 1 }
 0x128   : > { %v1553_v56 = vadd.f32 %v1437_v58, %v1091_v44 }
 0x129   : > { %v978_v63 = vpop.f32.mrf.mxu1  ;;  %v6861_v59 = vpop.f32.mrf.mxu3 }
 0x12a   : > { %v2014_v6 = vadd.f32 %v6792_v17, %v1553_v56  ;;  %v6033_v17 = vld [vmem:[%s6429_s30 + $0x70] sm:$0xff]  ;;  %v1092_v34 = vadd.f32 %v978_v63, %v6706_v19  ;;  %v833_v63 = vor.u32 %v831_v28, %v829_v5  ;;  %v6100_v28 = vld [vmem:[%s6429_s30 + $0x80] sm:$0xff] }
 0x12b   : > { %v835_v44 = vshll.u32 %v6033_v17, 16  ;;  %v2354_v1 = vshrl.u32 %v6100_v28, 16 }
 0x12c   : > { %v2496_v7 = vpop.f32.mrf.mxu0  ;;  %5191 = vmatmul.msk.bf16.gmra.mxu1 %vm393_vm0, %v830_v43  ;;  %5305 = vmatmul.msk.bf16.gmra.mxu2 %vm393_vm0, %v1322_v27  ;;  %v6865_v31 = vadd.f32 %v2493_v32, %v2014_v6  ;;  %v2347_v43 = vrot.slane %v2345_v48, 1  ;;  %v2350_v27 = vrot.slane %v2348_v42, 2  ;;  %v1324_v48 = vsel %vm1295_vm1, %v1321_v41, %v1323_v14 }
 0x12d   : > { %v1788_v42 = vrot.slane %v6079_v61, 1 }
 0x12e   : > { %5421 = vmatmul.msk.bf16.gmra.mxu3 %vm393_vm0, %v1787_v8  ;;  %v2351_v51 = vor.u32 %v2350_v27, %v2347_v43 }
 0x12f   : > { %5533 = vmatmul.msk.bf16.gmra.mxu0 %vm393_vm0, %v2343_v4  ;;  %v1440_v46 = vpop.f32.mrf.mxu2  ;;  %v837_v4 = vrot.slane %v835_v44, 1  ;;  %v1789_v41 = vsel %vm1295_vm1, %v1786_v10, %v1788_v42 }
 0x130   : > { %v1554_v32 = vadd.f32 %v1440_v46, %v1092_v34  ;;  %v2352_v5 = vsel %vm2218_vm3, %v2342_v0, %v2351_v51 }
 0x131   : > { %v980_v20 = vpop.f32.mrf.mxu1  ;;  %v6878_v6 = vpop.f32.mrf.mxu3 }
 0x132   : > { %v2015_v58 = vadd.f32 %v6805_v23, %v1554_v32  ;;  %v1093_v8 = vadd.f32 %v980_v20, %v6729_v50  ;;  %v838_v23 = vsel %vm722_vm2, %v833_v63, %v837_v4  ;;  %v6034_v20 = vld [vmem:[%s6429_s30 + $0x78] sm:$0xff]  ;;  %v839_v63 = vshrl.u32 %v6033_v17, 16 }
 0x133   : > { %v843_v61 = vshll.u32 %v6034_v20, 16 }
 0x134   : > { %v2498_v56 = vpop.f32.mrf.mxu0  ;;  %v6880_v19 = vadd.f32 %v2496_v7, %v2015_v58  ;;  %v2357_v58 = vshll.u32 %v6100_v28, 16 }
 0x137   : > { %v1442_v29 = vpop.f32.mrf.mxu2 }
 0x138   : > { %v1555_v34 = vadd.f32 %v1442_v29, %v1093_v8  ;;  %v6056_v8 = vld [vmem:[%s6429_s30 + $0x78] sm:$0xff] }
 0x139   : > { %v983_v46 = vpop.f32.mrf.mxu1  ;;  %v6889_v44 = vpop.f32.mrf.mxu3 }
 0x13a   : > { %v2016_v7 = vadd.f32 %v6819_v62, %v1555_v34  ;;  %v1094_v62 = vadd.f32 %v983_v46, %v6589_v13  ;;  %v2356_v34 = vrot.slane %v2354_v1, 1  ;;  %v841_v13 = vor.u32 %v839_v63, %v837_v4  ;;  %v6101_v63 = vld [vmem:[%s6429_s30 + $0x88] sm:$0xff] }
 0x13b   : > { %v845_v46 = vrot.slane %v843_v61, 1 }
 0x13c   : > { %v2501_v32 = vpop.f32.mrf.mxu0  ;;  %5192 = vmatmul.msk.bf16.gmra.mxu1 %vm393_vm0, %v838_v23  ;;  %5306 = vmatmul.msk.bf16.gmra.mxu2 %vm393_vm0, %v1324_v48  ;;  %v6893_v50 = vadd.f32 %v2498_v56, %v2016_v7  ;;  %v2359_v23 = vrot.slane %v2357_v58, 2  ;;  %v1325_v7 = vrot.slane %v6056_v8, 1  ;;  %v2363_v8 = vshrl.u32 %v6101_v63, 16 }
 0x13d   : > { %v846_v1 = vsel %vm722_vm2, %v841_v13, %v845_v46 }
 0x13e   : > { %7615 = vst [vmem:[#allocation6_spill] sm:$0xff] %v6893_v50  ;;  %5422 = vmatmul.msk.bf16.gmra.mxu3 %vm393_vm0, %v1789_v41  ;;  %v2360_v17 = vor.u32 %v2359_v23, %v2356_v34  ;;  %v1326_v58 = vsel %vm1295_vm1, %v1323_v14, %v1325_v7  ;;  %v6924_v14 = vld [vmem:[%s6429_s30 + $0x80] sm:$0xff] }
 0x13f   : > { %5534 = vmatmul.msk.bf16.gmra.mxu0 %vm393_vm0, %v2352_v5  ;;  %v1445_v0 = vpop.f32.mrf.mxu2  ;;  %v6907_v5 = vld [vmem:[%s6429_s30 + $0x90] sm:$0xff] }
 0x140   : > { %v1556_v43 = vadd.f32 %v1445_v0, %v1094_v62 }
 0x141   : > { %v985_v27 = vpop.f32.mrf.mxu1  ;;  %v6902_v48 = vpop.f32.mrf.mxu3 }
 0x142   : > { %v2017_v56 = vadd.f32 %v6843_v45, %v1556_v43  ;;  %v1095_v28 = vadd.f32 %v985_v27, %v6608_v26  ;;  %v2361_v43 = vsel %vm2218_vm3, %v2351_v51, %v2360_v17  ;;  %v2366_v51 = vshll.u32 %v6101_v63, 16 }
 0x144   : > { %v2503_v29 = vpop.f32.mrf.mxu0  ;;  %v6904_v10 = vadd.f32 %v2501_v32, %v2017_v56  ;;  %v1790_v32 = vrot.slane %v6907_v5, 1  ;;  %v1654_v56 = vld [vmem:[%s6429_s30 + $0x98] sm:$0x1]  ;;  %v847_v5 = vshrl.u32 %v6034_v20, 16 }
 0x146   : > { %7616 = vst [vmem:[#allocation7_spill] sm:$0xff] %v6904_v10  ;;  %v1791_v27 = vsel %vm1295_vm1, %v1788_v42, %v1790_v32  ;;  %v2365_v42 = vrot.slane %v2363_v8, 1 }
 0x147   : > { %v1447_v41 = vpop.f32.mrf.mxu2 }
 0x148   : > { %v1557_v62 = vadd.f32 %v1447_v41, %v1095_v28  ;;  %v6932_v28 = vld [vmem:[%s6429_s30 + $0x80] sm:$0xff]  ;;  %v1737_v41 = vunpack.c.l.b16 %v1654_v56 }
 0x149   : > { %v988_v45 = vpop.f32.mrf.mxu1  ;;  %v6916_v61 = vpop.f32.mrf.mxu3  ;;  %v1327_v63 = vrot.slane %v6932_v28, 1  ;;  %v5777_v28 = vld [vmem:[%s6429_s30 + $0x10] sm:$0xc] }
 0x14a   : > { %v2018_v4 = vadd.f32 %v6861_v59, %v1557_v62  ;;  %v1096_v59 = vadd.f32 %v988_v45, %v6618_v40  ;;  %v1756_v20 = vpack.c.b16 %v1737_v41, %v1737_v41  ;;  %v6151_v41 = vld [vmem:[%s6429_s30 + $0x10] sm:$0xf0] }
 0x14c   : > { %v2506_v0 = vpop.f32.mrf.mxu0  ;;  %5193 = vmatmul.msk.bf16.gmra.mxu1 %vm393_vm0, %v846_v1  ;;  %5307 = vmatmul.msk.bf16.gmra.mxu2 %vm393_vm0, %v1326_v58  ;;  %v6920_v26 = vadd.f32 %v2503_v29, %v2018_v4  ;;  %v851_v29 = vshll.u32 %v6924_v14, 16  ;;  %v2368_v58 = vrot.slane %v2366_v51, 2  ;;  %v849_v4 = vor.u32 %v847_v5, %v845_v46 }
 0x14d   : > { %v1792_v46 = vrot.slane %v1756_v20, 1 }
 0x14e   : > { %7617 = vst [vmem:[#allocation8_spill] sm:$0xff] %v6920_v26  ;;  %5423 = vmatmul.msk.bf16.gmra.mxu3 %vm393_vm0, %v1791_v27 }
 0x14f   : > { %5535 = vmatmul.msk.bf16.gmra.mxu0 %vm393_vm0, %v2361_v43  ;;  %v1450_v34 = vpop.f32.mrf.mxu2  ;;  %v853_v43 = vrot.slane %v851_v29, 1  ;;  %v6954_v29 = vld [vmem:[%s6429_s30 + $0x88] sm:$0xff] }
 0x150   : > { %v1558_v23 = vadd.f32 %v1450_v34, %v1096_v59  ;;  %v6941_v59 = vor.u32 %v2368_v58, %v2365_v42 }
 0x151   : > { %v990_v13 = vpop.f32.mrf.mxu1  ;;  %v6935_v40 = vpop.f32.mrf.mxu3  ;;  %v854_v56 = vsel %vm722_vm2, %v849_v4, %v853_v43 }
 0x152   : > { %v2019_v62 = vadd.f32 %v6878_v6, %v1558_v23  ;;  %v1097_v27 = vadd.f32 %v990_v13, %v6636_v53  ;;  %v2370_v5 = vsel %vm2218_vm3, %v2360_v17, %v6941_v59  ;;  %v6102_v53 = vld [vmem:[%s6429_s30 + $0x90] sm:$0xff]  ;;  %v5778_v17 = vor.u32 %v6151_v41, %v5777_v28 }
 0x153   : > { %v2372_v58 = vshrl.u32 %v6102_v53, 16  ;;  %v2375_v4 = vshll.u32 %v6102_v53, 16 }
 0x154   : > { %v2508_v1 = vpop.f32.mrf.mxu0  ;;  %v6937_v45 = vadd.f32 %v2506_v0, %v2019_v62  ;;  %v1328_v0 = vsel %vm1295_vm1, %v1325_v7, %v1327_v63  ;;  %v6152_v62 = vld [vmem:[%s6429_s30 + $0x18] sm:$0xff] }
 0x155   : > { %v2377_v53 = vrot.slane %v2375_v4, 2 }
 0x156   : > { %7618 = vst [vmem:[#allocation9_spill] sm:$0xff] %v6937_v45 }
 0x157   : > { %v1452_v6 = vpop.f32.mrf.mxu2 }
 0x158   : > { %v1559_v8 = vadd.f32 %v1452_v6, %v1097_v27  ;;  %v855_v6 = vshrl.u32 %v6924_v14, 16  ;;  %v2115_v14 = vld [vmem:[%s6429_s30 + $0x98] sm:$0x3] }
 0x159   : > { %v993_v51 = vpop.f32.mrf.mxu1  ;;  %v6949_v13 = vpop.f32.mrf.mxu3 }
 0x15a   : > { %v2020_v34 = vadd.f32 %v6889_v44, %v1559_v8  ;;  %v1793_v44 = vsel %vm1295_vm1, %v1790_v32, %v1792_v46  ;;  %v1098_v42 = vadd.f32 %v993_v51, %v6646_v3  ;;  %v859_v8 = vshll.u32 %v6954_v29, 16 }
 0x15b   : > { %v3741_v32 = vshll.u32 %v5778_v17, 16  ;;  %v3746_v46 = vshrl.u32 %v6152_v62, 16  ;;  %v857_v41 = vor.u32 %v855_v6, %v853_v43 }
 0x15c   : > { %v2511_v23 = vpop.f32.mrf.mxu0  ;;  %5194 = vmatmul.msk.bf16.gmra.mxu1 %vm393_vm0, %v854_v56  ;;  %5308 = vmatmul.msk.bf16.gmra.mxu2 %vm393_vm0, %v1328_v0  ;;  %v6958_v7 = vadd.f32 %v2508_v1, %v2020_v34  ;;  %v6967_v56 = vld [vmem:[%s6429_s30 + $0x88] sm:$0xff]  ;;  %v3738_v0 = vshrl.u32 %v5778_v17, 16  ;;  %v3749_v34 = vshll.u32 %v6152_v62, 16 }
 0x15d   : > { %v3743_v45 = vrot.slane %v3741_v32, 3  ;;  %v3748_v17 = vrot.slane %v3746_v46, 2 }
 0x15e   : > { %7619 = vst [vmem:[#allocation10_spill] sm:$0xff] %v6958_v7  ;;  %5424 = vmatmul.msk.bf16.gmra.mxu3 %vm393_vm0, %v1793_v44  ;;  %v3740_v44 = vrot.slane %v3738_v0, 2  ;;  %v3751_v26 = vrot.slane %v3749_v34, 3 }
 0x15f   : > { %5536 = vmatmul.msk.bf16.gmra.mxu0 %vm393_vm0, %v2370_v5  ;;  %v1455_v20 = vpop.f32.mrf.mxu2  ;;  %v2374_v5 = vrot.slane %v2372_v58, 1  ;;  %v2198_v58 = vunpack.c.l.b16 %v2115_v14 }
 0x160   : > { %v1560_v27 = vadd.f32 %v1455_v20, %v1098_v42  ;;  %v861_v42 = vrot.slane %v859_v8, 1  ;;  %v1329_v20 = vrot.slane %v6967_v56, 1  ;;  %v3744_v8 = vor.u32 %v3743_v45, %v3740_v44 }
 0x161   : > { %v995_v1 = vpop.f32.mrf.mxu1  ;;  %v6971_v28 = vpop.f32.mrf.mxu3  ;;  %v2378_v62 = vor.u32 %v2377_v53, %v2374_v5  ;;  %v3752_v0 = vor.u32 %v3751_v26, %v3748_v17  ;;  %v2217_v34 = vpack.c.b16 %v2198_v58, %v2198_v58  ;;  %v863_v44 = vshrl.u32 %v6954_v29, 16 }
 0x162   : > { %v2021_v3 = vadd.f32 %v6902_v48, %v1560_v27  ;;  %v1099_v48 = vadd.f32 %v995_v1, %v6664_v18  ;;  %v619_v27 = vld [vmem:[%s6429_s30 + $0x90] sm:$0x1]  ;;  %v862_v50 = vsel %vm722_vm2, %v857_v41, %v861_v42 }
 0x163   : > { %v702_v6 = vunpack.c.l.b16 %v619_v27  ;;  %v2379_v18 = vsel %vm2218_vm3, %v6941_v59, %v2378_v62  ;;  %v1192_v1 = vld [vmem:[%s6429_s30 + $0x90] sm:$0x1]  ;;  %v2381_v5 = vshrl.u32 %v2217_v34, 16  ;;  %v2384_v53 = vshll.u32 %v2217_v34, 16 }
 0x164   : > { %v2513_v51 = vpop.f32.mrf.mxu0  ;;  %v6975_v7 = vadd.f32 %v2511_v23, %v2021_v3  ;;  %v1330_v23 = vsel %vm1295_vm1, %v1327_v63, %v1329_v20  ;;  %v1275_v45 = vunpack.c.l.b16 %v1192_v1 }
 0x165   : > { %v721_v26 = vpack.c.b16 %v702_v6, %v702_v6  ;;  %v2386_v6 = vrot.slane %v2384_v53, 2 }
 0x166   : > { %v1294_v17 = vpack.c.b16 %v1275_v45, %v1275_v45 }
 0x167   : > { %v1457_v4 = vpop.f32.mrf.mxu2 }
 0x168   : > { %v1561_v10 = vadd.f32 %v1457_v4, %v1099_v48 }
 0x169   : > { %v998_v43 = vpop.f32.mrf.mxu1  ;;  %v6987_v3 = vpop.f32.mrf.mxu3 }
 0x16a   : > { %v2022_v32 = vadd.f32 %v6916_v61, %v1561_v10  ;;  %v3753_v10 = vsel %vm3736_vm4, %v3744_v8, %v3752_v0  ;;  %v6153_v61 = vld [vmem:[%s6429_s30 + $0x20] sm:$0xff]  ;;  %v1100_v59 = vadd.f32 %v998_v43, %v6674_v36  ;;  %v865_v36 = vor.u32 %v863_v44, %v861_v42 }
 0x16b   : > { %v3755_v48 = vshrl.u32 %v6153_v61, 16  ;;  %v3758_v27 = vshll.u32 %v6153_v61, 16 }
 0x16c   : > { %v2516_v46 = vpop.f32.mrf.mxu0  ;;  %5195 = vmatmul.msk.bf16.gmra.mxu1 %vm393_vm0, %v862_v50  ;;  %5309 = vmatmul.msk.bf16.gmra.mxu2 %vm393_vm0, %v1330_v23  ;;  %v6991_v63 = vadd.f32 %v2513_v51, %v2022_v32  ;;  %v867_v51 = vshll.u32 %v721_v26, 16  ;;  %v2383_v23 = vrot.slane %v2381_v5, 1 }
 0x16d   : > { %v3757_v29 = vrot.slane %v3755_v48, 2  ;;  %v3760_v1 = vrot.slane %v3758_v27, 3  ;;  %v6173_v48 = vld [vmem:[%s6429_s30 + $0x10] sm:$0xf0] }
 0x16e   : > { %5863 = vmatmul.msk.bf16.vlgmr.msra.gmra.mxu3 %vm393_vm0, %v3753_v10  ;;  %v869_v32 = vrot.slane %v867_v51, 1  ;;  %v2387_v26 = vor.u32 %v2386_v6, %v2383_v23  ;;  %v7032_v6 = vld [vmem:[%s6429_s30 + $0x18] sm:$0xff] }
 0x16f   : > { %5537 = vmatmul.msk.bf16.gmra.mxu0 %vm393_vm0, %v2379_v18  ;;  %v1460_v14 = vpop.f32.mrf.mxu2  ;;  %v1331_v18 = vrot.slane %v1294_v17, 1  ;;  %v5891_v17 = vld [vmem:[%s6429_s30 + $0x10] sm:$0x8] }
 0x170   : > { %v1562_v41 = vadd.f32 %v1460_v14, %v1100_v59  ;;  %v870_v61 = vsel %vm722_vm2, %v865_v36, %v869_v32  ;;  %v2388_v5 = vsel %vm2218_vm3, %v2378_v62, %v2387_v26  ;;  %v6107_v14 = vld [vmem:[%s6429_s30 + $0x8] sm:$0xf0]  ;;  %v5663_v62 = vld [vmem:[%s6429_s30 + $0x10] sm:$0xc] }
 0x171   : > { %v1000_v50 = vpop.f32.mrf.mxu1  ;;  %v7000_v8 = vpop.f32.mrf.mxu3  ;;  %v1332_v42 = vsel %vm1295_vm1, %v1329_v20, %v1331_v18  ;;  %v5549_v20 = vld [vmem:[%s6429_s30 + $0x8] sm:$0xc] }
 0x172   : > { %v2023_v58 = vadd.f32 %v6935_v40, %v1562_v41  ;;  %v1101_v34 = vadd.f32 %v1000_v50, %v6692_v55  ;;  %v6154_v41 = vld [vmem:[%s6429_s30 + $0x28] sm:$0xff]  ;;  %v6129_v50 = vld [vmem:[%s6429_s30 + $0x10] sm:$0xf0] }
 0x173   : > { %v5664_v36 = vor.u32 %v6129_v50, %v5663_v62  ;;  %v3767_v32 = vshll.u32 %v6154_v41, 16 }
 0x174   : > { %v2518_v4 = vpop.f32.mrf.mxu0  ;;  %v7002_v43 = vadd.f32 %v2516_v46, %v2023_v58  ;;  %v3761_v46 = vor.u32 %v3760_v1, %v3757_v29  ;;  %v7028_v58 = vld [vmem:[%s6429_s30 + $0x10] sm:$0xff]  ;;  %v6174_v29 = vld [vmem:[%s6429_s30 + $0x18] sm:$0xff]  ;;  %v5892_v1 = vor.u32 %v6173_v48, %v5891_v17 }
 0x177   : > { %v1462_v45 = vpop.f32.mrf.mxu2 }
 0x178   : > { %v1563_v10 = vadd.f32 %v1462_v45, %v1101_v34  ;;  %v2815_v45 = vrot.slane %v7028_v58, 2  ;;  %v6155_v58 = vld [vmem:[%s6429_s30 + $0x30] sm:$0xff] }
 0x179   : > { %v1003_v40 = vpop.f32.mrf.mxu1  ;;  %v7011_v53 = vpop.f32.mrf.mxu3 }
 0x17a   : > { %v2024_v59 = vadd.f32 %v6949_v13, %v1563_v10  ;;  %v3762_v13 = vsel %vm3736_vm4, %v3752_v0, %v3761_v46  ;;  %v1102_v44 = vadd.f32 %v1003_v40, %v6702_v12  ;;  %v3764_v0 = vshrl.u32 %v6154_v41, 16 }
 0x17b   : > { %v3275_v40 = vrot.slane %v5664_v36, 2  ;;  %v6109_v36 = vld [vmem:[%s6429_s30 + $0x18] sm:$0xff] }
 0x17c   : > { %v2521_v55 = vpop.f32.mrf.mxu0  ;;  %5196 = vmatmul.msk.bf16.gmra.mxu1 %vm393_vm0, %v870_v61  ;;  %5310 = vmatmul.msk.bf16.gmra.mxu2 %vm393_vm0, %v1332_v42  ;;  %v7015_v56 = vadd.f32 %v2518_v4, %v2024_v59  ;;  %v5550_v4 = vor.u32 %v6107_v14, %v5549_v20  ;;  %v3276_v61 = vrot.slane %v7032_v6, 2  ;;  %v3766_v42 = vrot.slane %v3764_v0, 2  ;;  %v6131_v0 = vld [vmem:[%s6429_s30 + $0x20] sm:$0xff] }
 0x17d   : > { %v3769_v59 = vrot.slane %v3767_v32, 3  ;;  %v4332_v20 = vrot.slane %v5892_v1, 3  ;;  %v3773_v32 = vshrl.u32 %v6155_v58, 16  ;;  %v6175_v1 = vld [vmem:[%s6429_s30 + $0x20] sm:$0xff] }
 0x17e   : > { %5864 = vmatmul.msk.bf16.gmra.mxu3 %vm393_vm0, %v3762_v13  ;;  %v2814_v26 = vrot.slane %v5550_v4, 2 }
 0x17f   : > { %5538 = vmatmul.msk.bf16.gmra.mxu0 %vm393_vm0, %v2388_v5  ;;  %v1465_v51 = vpop.f32.mrf.mxu2  ;;  %v3770_v62 = vor.u32 %v3769_v59, %v3766_v42  ;;  %v3278_v42 = vrot.slane %v6131_v0, 2 }
 0x180   : > { %v1564_v27 = vadd.f32 %v1465_v51, %v1102_v44  ;;  %v2816_v44 = vsel %vm2813_vm5, %v2814_v26, %v2815_v45 }
 0x181   : > { %v1005_v23 = vpop.f32.mrf.mxu1  ;;  %v7036_v34 = vpop.f32.mrf.mxu3 }
 0x182   : > { %v2025_v12 = vadd.f32 %v6971_v28, %v1564_v27  ;;  %v1103_v5 = vadd.f32 %v1005_v23, %v6726_v38  ;;  %v4333_v28 = vrot.slane %v6174_v29, 3  ;;  %v3771_v27 = vsel %vm3736_vm4, %v3761_v46, %v3770_v62 }
 0x183   : > { %v2817_v46 = vrot.slane %v6109_v36, 2 }
 0x184   : > { %v2523_v18 = vpop.f32.mrf.mxu0  ;;  %v7039_v10 = vadd.f32 %v2521_v55, %v2025_v12  ;;  %v3277_v55 = vsel %vm2813_vm5, %v3275_v40, %v3276_v61  ;;  %v4334_v38 = vsel %vm4331_vm6, %v4332_v20, %v4333_v28  ;;  %v3776_v12 = vshll.u32 %v6155_v58, 16 }
 0x185   : > { %v4335_v20 = vrot.slane %v6175_v1, 3 }
 0x186   : > { %v3778_v59 = vrot.slane %v3776_v12, 3  ;;  %v6176_v12 = vld [vmem:[%s6429_s30 + $0x28] sm:$0xff] }
 0x187   : > { %v1467_v14 = vpop.f32.mrf.mxu2 }
 0x188   : > { %v1565_v13 = vadd.f32 %v1467_v14, %v1103_v5 }
 0x189   : > { %v1008_v41 = vpop.f32.mrf.mxu1  ;;  %v7047_v17 = vpop.f32.mrf.mxu3 }
 0x18a   : > { %v2026_v50 = vadd.f32 %v6987_v3, %v1565_v13  ;;  %v1104_v3 = vadd.f32 %v1008_v41, %v6605_v25  ;;  %v3775_v25 = vrot.slane %v3773_v32, 2 }
 0x18c   : > { %v2526_v51 = vpop.f32.mrf.mxu0  ;;  %5635 = vmatmul.msk.bf16.vlgmr.msra.gmra.mxu1 %vm393_vm0, %v2816_v44  ;;  %5749 = vmatmul.msk.bf16.vlgmr.msra.gmra.mxu2 %vm393_vm0, %v3277_v55  ;;  %v7051_v48 = vadd.f32 %v2523_v18, %v2026_v50  ;;  %v2818_v44 = vsel %vm2813_vm5, %v2815_v45, %v2817_v46  ;;  %v3779_v55 = vor.u32 %v3778_v59, %v3775_v25 }
 0x18e   : > { %5865 = vmatmul.msk.bf16.gmra.mxu3 %vm393_vm0, %v3771_v27  ;;  %v3780_v45 = vsel %vm3736_vm4, %v3770_v62, %v3779_v55 }
 0x18f   : > { %5977 = vmatmul.msk.bf16.vlgmr.msra.gmra.mxu0 %vm393_vm0, %v4334_v38  ;;  %v1470_v4 = vpop.f32.mrf.mxu2  ;;  %v4336_v38 = vsel %vm4331_vm6, %v4333_v28, %v4335_v20 }
 0x190   : > { %v1566_v23 = vadd.f32 %v1470_v4, %v1104_v3  ;;  %v6110_v4 = vld [vmem:[%s6429_s30 + $0x20] sm:$0xff] }
 0x191   : > { %v1010_v6 = vpop.f32.mrf.mxu1  ;;  %v7062_v26 = vpop.f32.mrf.mxu3  ;;  %v2819_v62 = vrot.slane %v6110_v4, 2 }
 0x192   : > { %v2027_v29 = vadd.f32 %v7000_v8, %v1566_v23  ;;  %v1105_v5 = vadd.f32 %v1010_v6, %v6616_v39  ;;  %v3279_v8 = vsel %vm2813_vm5, %v3276_v61, %v3278_v42  ;;  %v6156_v61 = vld [vmem:[%s6429_s30 + $0x38] sm:$0xff]  ;;  %v6132_v23 = vld [vmem:[%s6429_s30 + $0x28] sm:$0xff] }
 0x193   : > { %v3782_v6 = vshrl.u32 %v6156_v61, 16  ;;  %v3785_v36 = vshll.u32 %v6156_v61, 16  ;;  %v3280_v1 = vrot.slane %v6132_v23, 2 }
 0x194   : > { %v2528_v18 = vpop.f32.mrf.mxu0  ;;  %v7064_v40 = vadd.f32 %v2526_v51, %v2027_v29 }
 0x195   : > { %v3787_v25 = vrot.slane %v3785_v36, 3  ;;  %v6177_v36 = vld [vmem:[%s6429_s30 + $0x30] sm:$0xff] }
 0x197   : > { %v1472_v14 = vpop.f32.mrf.mxu2 }
 0x198   : > { %v1567_v13 = vadd.f32 %v1472_v14, %v1105_v5  ;;  %v4337_v5 = vrot.slane %v6176_v12, 3 }
 0x199   : > { %v1013_v41 = vpop.f32.mrf.mxu1  ;;  %v7071_v27 = vpop.f32.mrf.mxu3 }
 0x19a   : > { %v2028_v50 = vadd.f32 %v7011_v53, %v1567_v13  ;;  %v1106_v53 = vadd.f32 %v1013_v41, %v6633_v52  ;;  %v3784_v52 = vrot.slane %v3782_v6, 2 }
 0x19c   : > { %v2531_v51 = vpop.f32.mrf.mxu0  ;;  %5636 = vmatmul.msk.bf16.gmra.mxu1 %vm393_vm0, %v2818_v44  ;;  %5750 = vmatmul.msk.bf16.gmra.mxu2 %vm393_vm0, %v3279_v8  ;;  %v7075_v39 = vadd.f32 %v2528_v18, %v2028_v50  ;;  %v2820_v44 = vsel %vm2813_vm5, %v2817_v46, %v2819_v62  ;;  %v3788_v8 = vor.u32 %v3787_v25, %v3784_v52 }
 0x19e   : > { %5866 = vmatmul.msk.bf16.gmra.mxu3 %vm393_vm0, %v3780_v45  ;;  %v3789_v46 = vsel %vm3736_vm4, %v3779_v55, %v3788_v8 }
 0x19f   : > { %5978 = vmatmul.msk.bf16.gmra.mxu0 %vm393_vm0, %v4336_v38  ;;  %v1475_v58 = vpop.f32.mrf.mxu2  ;;  %v4338_v38 = vsel %vm4331_vm6, %v4335_v20, %v4337_v5 }
 0x1a0   : > { %v1568_v3 = vadd.f32 %v1475_v58, %v1106_v53  ;;  %v6111_v58 = vld [vmem:[%s6429_s30 + $0x28] sm:$0xff] }
 0x1a1   : > { %v1015_v28 = vpop.f32.mrf.mxu1  ;;  %v7086_v29 = vpop.f32.mrf.mxu3  ;;  %v2821_v55 = vrot.slane %v6111_v58, 2 }
 0x1a2   : > { %v2029_v0 = vadd.f32 %v7036_v34, %v1568_v3  ;;  %v1107_v59 = vadd.f32 %v1015_v28, %v6644_v2  ;;  %v3281_v34 = vsel %vm2813_vm5, %v3278_v42, %v3280_v1  ;;  %v6157_v42 = vld [vmem:[%s6429_s30 + $0x40] sm:$0xff]  ;;  %v6133_v3 = vld [vmem:[%s6429_s30 + $0x30] sm:$0xff] }
 0x1a3   : > { %v3791_v28 = vshrl.u32 %v6157_v42, 16  ;;  %v3794_v4 = vshll.u32 %v6157_v42, 16  ;;  %v3282_v12 = vrot.slane %v6133_v3, 2 }
 0x1a4   : > { %v2533_v32 = vpop.f32.mrf.mxu0  ;;  %v7088_v18 = vadd.f32 %v2531_v51, %v2029_v0 }
 0x1a5   : > { %v3796_v52 = vrot.slane %v3794_v4, 3  ;;  %v6178_v4 = vld [vmem:[%s6429_s30 + $0x38] sm:$0xff] }
 0x1a7   : > { %v1477_v14 = vpop.f32.mrf.mxu2 }
 0x1a8   : > { %v1569_v13 = vadd.f32 %v1477_v14, %v1107_v59  ;;  %v4339_v59 = vrot.slane %v6177_v36, 3 }
 0x1a9   : > { %v1018_v41 = vpop.f32.mrf.mxu1  ;;  %v7095_v45 = vpop.f32.mrf.mxu3 }
 0x1aa   : > { %v2030_v50 = vadd.f32 %v7047_v17, %v1569_v13  ;;  %v1108_v17 = vadd.f32 %v1018_v41, %v6661_v16  ;;  %v3793_v16 = vrot.slane %v3791_v28, 2 }
 0x1ac   : > { %v2536_v51 = vpop.f32.mrf.mxu0  ;;  %5637 = vmatmul.msk.bf16.gmra.mxu1 %vm393_vm0, %v2820_v44  ;;  %5751 = vmatmul.msk.bf16.gmra.mxu2 %vm393_vm0, %v3281_v34  ;;  %v7099_v2 = vadd.f32 %v2533_v32, %v2030_v50  ;;  %v2822_v44 = vsel %vm2813_vm5, %v2819_v62, %v2821_v55  ;;  %v3797_v34 = vor.u32 %v3796_v52, %v3793_v16 }
 0x1ae   : > { %5867 = vmatmul.msk.bf16.gmra.mxu3 %vm393_vm0, %v3789_v46  ;;  %v3798_v62 = vsel %vm3736_vm4, %v3788_v8, %v3797_v34 }
 0x1af   : > { %5979 = vmatmul.msk.bf16.gmra.mxu0 %vm393_vm0, %v4338_v38  ;;  %v1480_v61 = vpop.f32.mrf.mxu2  ;;  %v4340_v38 = vsel %vm4331_vm6, %v4337_v5, %v4339_v59 }
 0x1b0   : > { %v1570_v53 = vadd.f32 %v1480_v61, %v1108_v17  ;;  %v6112_v61 = vld [vmem:[%s6429_s30 + $0x30] sm:$0xff] }
 0x1b1   : > { %v1020_v20 = vpop.f32.mrf.mxu1  ;;  %v7110_v0 = vpop.f32.mrf.mxu3  ;;  %v2823_v8 = vrot.slane %v6112_v61, 2 }
 0x1b2   : > { %v2031_v23 = vadd.f32 %v7062_v26, %v1570_v53  ;;  %v1109_v25 = vadd.f32 %v1020_v20, %v6672_v35  ;;  %v3283_v26 = vsel %vm2813_vm5, %v3280_v1, %v3282_v12  ;;  %v6158_v1 = vld [vmem:[%s6429_s30 + $0x48] sm:$0xff]  ;;  %v6134_v53 = vld [vmem:[%s6429_s30 + $0x38] sm:$0xff] }
 0x1b3   : > { %v3800_v20 = vshrl.u32 %v6158_v1, 16  ;;  %v3803_v58 = vshll.u32 %v6158_v1, 16  ;;  %v3284_v36 = vrot.slane %v6134_v53, 2 }
 0x1b4   : > { %v2538_v6 = vpop.f32.mrf.mxu0  ;;  %v7112_v32 = vadd.f32 %v2536_v51, %v2031_v23 }
 0x1b5   : > { %v3805_v16 = vrot.slane %v3803_v58, 3  ;;  %v6179_v58 = vld [vmem:[%s6429_s30 + $0x40] sm:$0xff] }
 0x1b7   : > { %v1482_v14 = vpop.f32.mrf.mxu2 }
 0x1b8   : > { %v1571_v13 = vadd.f32 %v1482_v14, %v1109_v25  ;;  %v4341_v25 = vrot.slane %v6178_v4, 3 }
 0x1b9   : > { %v1023_v41 = vpop.f32.mrf.mxu1  ;;  %v7119_v46 = vpop.f32.mrf.mxu3 }
 0x1ba   : > { %v2032_v50 = vadd.f32 %v7071_v27, %v1571_v13  ;;  %v1110_v27 = vadd.f32 %v1023_v41, %v6689_v54  ;;  %v3802_v54 = vrot.slane %v3800_v20, 2 }
 0x1bc   : > { %v2541_v51 = vpop.f32.mrf.mxu0  ;;  %5638 = vmatmul.msk.bf16.gmra.mxu1 %vm393_vm0, %v2822_v44  ;;  %5752 = vmatmul.msk.bf16.gmra.mxu2 %vm393_vm0, %v3283_v26  ;;  %v7123_v35 = vadd.f32 %v2538_v6, %v2032_v50  ;;  %v2824_v44 = vsel %vm2813_vm5, %v2821_v55, %v2823_v8  ;;  %v3806_v26 = vor.u32 %v3805_v16, %v3802_v54 }
 0x1be   : > { %5868 = vmatmul.msk.bf16.gmra.mxu3 %vm393_vm0, %v3798_v62  ;;  %v3807_v55 = vsel %vm3736_vm4, %v3797_v34, %v3806_v26 }
 0x1bf   : > { %5980 = vmatmul.msk.bf16.gmra.mxu0 %vm393_vm0, %v4340_v38  ;;  %v1485_v42 = vpop.f32.mrf.mxu2  ;;  %v4342_v38 = vsel %vm4331_vm6, %v4339_v59, %v4341_v25 }
 0x1c0   : > { %v1572_v17 = vadd.f32 %v1485_v42, %v1110_v27  ;;  %v6113_v42 = vld [vmem:[%s6429_s30 + $0x38] sm:$0xff] }
 0x1c1   : > { %v1025_v5 = vpop.f32.mrf.mxu1  ;;  %v7134_v23 = vpop.f32.mrf.mxu3  ;;  %v2825_v34 = vrot.slane %v6113_v42, 2 }
 0x1c2   : > { %v2033_v3 = vadd.f32 %v7086_v29, %v1572_v17  ;;  %v1111_v52 = vadd.f32 %v1025_v5, %v6700_v9  ;;  %v3285_v29 = vsel %vm2813_vm5, %v3282_v12, %v3284_v36  ;;  %v6159_v12 = vld [vmem:[%s6429_s30 + $0x50] sm:$0xff]  ;;  %v6135_v17 = vld [vmem:[%s6429_s30 + $0x40] sm:$0xff] }
 0x1c3   : > { %v3809_v5 = vshrl.u32 %v6159_v12, 16  ;;  %v3812_v61 = vshll.u32 %v6159_v12, 16  ;;  %v3286_v4 = vrot.slane %v6135_v17, 2 }
 0x1c4   : > { %v2543_v28 = vpop.f32.mrf.mxu0  ;;  %v7136_v6 = vadd.f32 %v2541_v51, %v2033_v3 }
 0x1c5   : > { %v3814_v54 = vrot.slane %v3812_v61, 3  ;;  %v6180_v61 = vld [vmem:[%s6429_s30 + $0x48] sm:$0xff] }
 0x1c7   : > { %v1487_v14 = vpop.f32.mrf.mxu2 }
 0x1c8   : > { %v1573_v13 = vadd.f32 %v1487_v14, %v1111_v52  ;;  %v4343_v52 = vrot.slane %v6179_v58, 3 }
 0x1c9   : > { %v1028_v41 = vpop.f32.mrf.mxu1  ;;  %v7143_v62 = vpop.f32.mrf.mxu3 }
 0x1ca   : > { %v2034_v50 = vadd.f32 %v7095_v45, %v1573_v13  ;;  %v1112_v45 = vadd.f32 %v1028_v41, %v6723_v37  ;;  %v3811_v37 = vrot.slane %v3809_v5, 2 }
 0x1cc   : > { %v2546_v51 = vpop.f32.mrf.mxu0  ;;  %5639 = vmatmul.msk.bf16.gmra.mxu1 %vm393_vm0, %v2824_v44  ;;  %5753 = vmatmul.msk.bf16.gmra.mxu2 %vm393_vm0, %v3285_v29  ;;  %v7147_v9 = vadd.f32 %v2543_v28, %v2034_v50  ;;  %v2826_v44 = vsel %vm2813_vm5, %v2823_v8, %v2825_v34  ;;  %v3815_v29 = vor.u32 %v3814_v54, %v3811_v37 }
 0x1ce   : > { %5869 = vmatmul.msk.bf16.gmra.mxu3 %vm393_vm0, %v3807_v55  ;;  %v3816_v8 = vsel %vm3736_vm4, %v3806_v26, %v3815_v29 }
 0x1cf   : > { %5981 = vmatmul.msk.bf16.gmra.mxu0 %vm393_vm0, %v4342_v38  ;;  %v1490_v1 = vpop.f32.mrf.mxu2  ;;  %v4344_v38 = vsel %vm4331_vm6, %v4341_v25, %v4343_v52 }
 0x1d0   : > { %v1574_v27 = vadd.f32 %v1490_v1, %v1112_v45  ;;  %v6114_v1 = vld [vmem:[%s6429_s30 + $0x40] sm:$0xff] }
 0x1d1   : > { %v1030_v59 = vpop.f32.mrf.mxu1  ;;  %v7158_v3 = vpop.f32.mrf.mxu3  ;;  %v2827_v26 = vrot.slane %v6114_v1, 2 }
 0x1d2   : > { %v2035_v53 = vadd.f32 %v7110_v0, %v1574_v27  ;;  %v1113_v16 = vadd.f32 %v1030_v59, %v6740_v11  ;;  %v3287_v0 = vsel %vm2813_vm5, %v3284_v36, %v3286_v4  ;;  %v6160_v36 = vld [vmem:[%s6429_s30 + $0x58] sm:$0xff]  ;;  %v6136_v27 = vld [vmem:[%s6429_s30 + $0x48] sm:$0xff] }
 0x1d3   : > { %v3818_v59 = vshrl.u32 %v6160_v36, 16  ;;  %v3821_v42 = vshll.u32 %v6160_v36, 16  ;;  %v3288_v58 = vrot.slane %v6136_v27, 2 }
 0x1d4   : > { %v2548_v20 = vpop.f32.mrf.mxu0  ;;  %v7160_v28 = vadd.f32 %v2546_v51, %v2035_v53 }
 0x1d5   : > { %v3823_v37 = vrot.slane %v3821_v42, 3  ;;  %v6181_v42 = vld [vmem:[%s6429_s30 + $0x50] sm:$0xff] }
 0x1d7   : > { %v1492_v14 = vpop.f32.mrf.mxu2 }
 0x1d8   : > { %v1575_v13 = vadd.f32 %v1492_v14, %v1113_v16  ;;  %v4345_v16 = vrot.slane %v6180_v61, 3 }
 0x1d9   : > { %v1033_v41 = vpop.f32.mrf.mxu1  ;;  %v7167_v55 = vpop.f32.mrf.mxu3 }
 0x1da   : > { %v2036_v50 = vadd.f32 %v7119_v46, %v1575_v13  ;;  %v1114_v46 = vadd.f32 %v1033_v41, %v6613_v33  ;;  %v3820_v33 = vrot.slane %v3818_v59, 2 }
 0x1dc   : > { %v2551_v51 = vpop.f32.mrf.mxu0  ;;  %5640 = vmatmul.msk.bf16.gmra.mxu1 %vm393_vm0, %v2826_v44  ;;  %5754 = vmatmul.msk.bf16.gmra.mxu2 %vm393_vm0, %v3287_v0  ;;  %v7171_v11 = vadd.f32 %v2548_v20, %v2036_v50  ;;  %v2828_v44 = vsel %vm2813_vm5, %v2825_v34, %v2827_v26  ;;  %v3824_v0 = vor.u32 %v3823_v37, %v3820_v33  ;;  %v7620_v37 = vld [vmem:[#allocation3_spill] sm:$0xff] }
 0x1de   : > { %5870 = vmatmul.msk.bf16.gmra.mxu3 %vm393_vm0, %v3816_v8  ;;  %v3825_v34 = vsel %vm3736_vm4, %v3815_v29, %v3824_v0 }
 0x1df   : > { %5982 = vmatmul.msk.bf16.gmra.mxu0 %vm393_vm0, %v4344_v38  ;;  %v1495_v12 = vpop.f32.mrf.mxu2  ;;  %v4346_v38 = vsel %vm4331_vm6, %v4343_v52, %v4345_v16 }
 0x1e0   : > { %v1576_v45 = vadd.f32 %v1495_v12, %v1114_v46  ;;  %v6115_v12 = vld [vmem:[%s6429_s30 + $0x48] sm:$0xff] }
 0x1e1   : > { %v1035_v25 = vpop.f32.mrf.mxu1  ;;  %v7182_v53 = vpop.f32.mrf.mxu3  ;;  %v2829_v29 = vrot.slane %v6115_v12, 2  ;;  %v6116_v12 = vld [vmem:[%s6429_s30 + $0x50] sm:$0xff] }
 0x1e2   : > { %v2037_v17 = vadd.f32 %v7134_v23, %v1576_v45  ;;  %v1115_v54 = vadd.f32 %v1035_v25, %v6626_v47  ;;  %v3289_v23 = vsel %vm2813_vm5, %v3286_v4, %v3288_v58  ;;  %v6161_v4 = vld [vmem:[%s6429_s30 + $0x60] sm:$0xff]  ;;  %v6137_v45 = vld [vmem:[%s6429_s30 + $0x50] sm:$0xff] }
 0x1e3   : > { %v3827_v25 = vshrl.u32 %v6161_v4, 16  ;;  %v3830_v1 = vshll.u32 %v6161_v4, 16  ;;  %v3290_v61 = vrot.slane %v6137_v45, 2  ;;  %v6138_v45 = vld [vmem:[%s6429_s30 + $0x58] sm:$0xff] }
 0x1e4   : > { %v2553_v5 = vpop.f32.mrf.mxu0  ;;  %v7184_v20 = vadd.f32 %v2551_v51, %v2037_v17 }
 0x1e5   : > { %v3832_v33 = vrot.slane %v3830_v1, 3 }
 0x1e7   : > { %v1497_v14 = vpop.f32.mrf.mxu2 }
 0x1e8   : > { %v1577_v13 = vadd.f32 %v1497_v14, %v1115_v54  ;;  %v4347_v14 = vrot.slane %v6181_v42, 3  ;;  %v6182_v42 = vld [vmem:[%s6429_s30 + $0x58] sm:$0xff] }
 0x1e9   : > { %v1038_v41 = vpop.f32.mrf.mxu1  ;;  %v7191_v8 = vpop.f32.mrf.mxu3 }
 0x1ea   : > { %v2038_v50 = vadd.f32 %v7143_v62, %v1577_v13  ;;  %v1116_v62 = vadd.f32 %v1038_v41, %v6641_v60  ;;  %v3829_v60 = vrot.slane %v3827_v25, 2 }
 0x1ec   : > { %v2556_v51 = vpop.f32.mrf.mxu0  ;;  %5641 = vmatmul.msk.bf16.gmra.mxu1 %vm393_vm0, %v2828_v44  ;;  %5755 = vmatmul.msk.bf16.gmra.mxu2 %vm393_vm0, %v3289_v23  ;;  %v7195_v47 = vadd.f32 %v2553_v5, %v2038_v50  ;;  %v2830_v23 = vsel %vm2813_vm5, %v2827_v26, %v2829_v29  ;;  %v3833_v50 = vor.u32 %v3832_v33, %v3829_v60 }
 0x1ee   : > { %5871 = vmatmul.msk.bf16.gmra.mxu3 %vm393_vm0, %v3825_v34  ;;  %v4348_v34 = vsel %vm4331_vm6, %v4345_v16, %v4347_v14  ;;  %v3834_v26 = vsel %vm3736_vm4, %v3824_v0, %v3833_v50  ;;  %v2831_v0 = vrot.slane %v6116_v12, 2 }
 0x1ef   : > { %5983 = vmatmul.msk.bf16.gmra.mxu0 %vm393_vm0, %v4346_v38  ;;  %v1500_v36 = vpop.f32.mrf.mxu2 }
 0x1f0   : > { %v1578_v46 = vadd.f32 %v1500_v36, %v1116_v62  ;;  %v7621_v36 = vld [vmem:[#allocation4_spill] sm:$0xff] }
 0x1f1   : > { %v1040_v52 = vpop.f32.mrf.mxu1  ;;  %v7206_v17 = vpop.f32.mrf.mxu3 }
 0x1f2   : > { %v2039_v27 = vadd.f32 %v7158_v3, %v1578_v46  ;;  %v1117_v54 = vadd.f32 %v1040_v52, %v7620_v37  ;;  %v3291_v3 = vsel %vm2813_vm5, %v3288_v58, %v3290_v61  ;;  %v6162_v58 = vld [vmem:[%s6429_s30 + $0x68] sm:$0xff]  ;;  %v3292_v37 = vrot.slane %v6138_v45, 2  ;;  %v7251_v45 = vld [vmem:[%s6429_s30 + $0x58] sm:$0xff] }
 0x1f3   : > { %v3836_v25 = vshrl.u32 %v6162_v58, 16  ;;  %v3839_v1 = vshll.u32 %v6162_v58, 16 }
 0x1f4   : > { %v2558_v59 = vpop.f32.mrf.mxu0  ;;  %v7208_v5 = vadd.f32 %v2556_v51, %v2039_v27 }
 0x1f7   : > { %v1502_v13 = vpop.f32.mrf.mxu2 }
 0x1f8   : > { %v1579_v41 = vadd.f32 %v1502_v13, %v1117_v54  ;;  %v3838_v54 = vrot.slane %v3836_v25, 2  ;;  %v3841_v13 = vrot.slane %v3839_v1, 3  ;;  %v7254_v25 = vld [vmem:[%s6429_s30 + $0x60] sm:$0xff] }
 0x1f9   : > { %v1043_v44 = vpop.f32.mrf.mxu1  ;;  %v7215_v4 = vpop.f32.mrf.mxu3 }
 0x1fa   : > { %v2040_v51 = vadd.f32 %v7167_v55, %v1579_v41  ;;  %v1118_v55 = vadd.f32 %v1043_v44, %v7621_v36  ;;  %v7622_v41 = vld [vmem:[#allocation5_spill] sm:$0xff]  ;;  %v3842_v58 = vor.u32 %v3841_v13, %v3838_v54  ;;  %v7258_v54 = vld [vmem:[%s6429_s30 + $0x60] sm:$0xff]  ;;  %v3294_v13 = vrot.slane %v7254_v25, 2 }
 0x1fc   : > { %v2561_v38 = vpop.f32.mrf.mxu0  ;;  %5642 = vmatmul.msk.bf16.gmra.mxu1 %vm393_vm0, %v2830_v23  ;;  %5756 = vmatmul.msk.bf16.gmra.mxu2 %vm393_vm0, %v3291_v3  ;;  %v7219_v62 = vadd.f32 %v2558_v59, %v2040_v51  ;;  %v4349_v23 = vrot.slane %v6182_v42, 3 }
 0x1fe   : > { %5872 = vmatmul.msk.bf16.gmra.mxu3 %vm393_vm0, %v3834_v26  ;;  %v2832_v26 = vsel %vm2813_vm5, %v2829_v29, %v2831_v0  ;;  %v3843_v29 = vsel %vm3736_vm4, %v3833_v50, %v3842_v58 }
 0x1ff   : > { %5984 = vmatmul.msk.bf16.gmra.mxu0 %vm393_vm0, %v4348_v34  ;;  %v1505_v46 = vpop.f32.mrf.mxu2 }
 0x200   : > { %v1580_v52 = vadd.f32 %v1505_v46, %v1118_v55  ;;  %v4350_v55 = vsel %vm4331_vm6, %v4347_v14, %v4349_v23 }
 0x201   : > { %v1045_v16 = vpop.f32.mrf.mxu1  ;;  %v7230_v60 = vpop.f32.mrf.mxu3 }
 0x202   : > { %v2041_v27 = vadd.f32 %v7182_v53, %v1580_v52  ;;  %v1119_v44 = vadd.f32 %v1045_v16, %v7622_v41  ;;  %v3293_v53 = vsel %vm2813_vm5, %v3290_v61, %v3292_v37  ;;  %v6163_v61 = vld [vmem:[%s6429_s30 + $0x70] sm:$0xff] }
 0x203   : > { %v3845_v1 = vshrl.u32 %v6163_v61, 16 }
 0x204   : > { %v2563_v59 = vpop.f32.mrf.mxu0  ;;  %v7232_v33 = vadd.f32 %v2561_v38, %v2041_v27  ;;  %v3848_v27 = vshll.u32 %v6163_v61, 16 }
 0x205   : > { %v3847_v41 = vrot.slane %v3845_v1, 2 }
 0x207   : > { %v1507_v3 = vpop.f32.mrf.mxu2 }
 0x208   : > { %v1581_v51 = vadd.f32 %v1507_v3, %v1119_v44  ;;  %v3850_v44 = vrot.slane %v3848_v27, 3 }
 0x209   : > { %v2938_v34 = vpop.f32.mrf.mxu1  ;;  %v7239_v46 = vpop.f32.mrf.mxu3 }
 0x20a   : > { %v2042_v38 = vadd.f32 %v7191_v8, %v1581_v51  ;;  %v3064_v8 = vadd.f32 %v2938_v34, %v6759_v15  ;;  %v2833_v15 = vrot.slane %v7251_v45, 2  ;;  %v7267_v51 = vld [vmem:[%s7609_s2] ss:$0 sm:$0xff]  ;;  %v3851_v61 = vor.u32 %v3850_v44, %v3847_v41  ;;  %v6164_v45 = vld [vmem:[%s6429_s30 + $0x78] sm:$0xff]  ;;  %v7298_v41 = vld [vmem:[%s6429_s30 + $0x68] sm:$0xff] }
 0x20b   : > { %v3857_v44 = vshll.u32 %v6164_v45, 16 }
 0x20c   : > { %v4456_v36 = vpop.f32.mrf.mxu0  ;;  %5643 = vmatmul.msk.bf16.gmra.mxu1 %vm393_vm0, %v2832_v26  ;;  %5757 = vmatmul.msk.bf16.gmra.mxu2 %vm393_vm0, %v3293_v53  ;;  %v7243_v52 = vadd.f32 %v2563_v59, %v2042_v38 }
 0x20e   : > { %5873 = vmatmul.msk.bf16.gmra.mxu3 %vm393_vm0, %v3843_v29  ;;  %v3295_v29 = vsel %vm2813_vm5, %v3292_v37, %v3294_v13  ;;  %v3852_v37 = vsel %vm3736_vm4, %v3842_v58, %v3851_v61  ;;  %v3854_v58 = vshrl.u32 %v6164_v45, 16 }
 0x20f   : > { %5985 = vmatmul.msk.bf16.gmra.mxu0 %vm393_vm0, %v4350_v55  ;;  %v3399_v16 = vpop.f32.mrf.mxu2  ;;  %v2834_v55 = vsel %vm2813_vm5, %v2831_v0, %v2833_v15 }
 0x210   : > { %v3525_v12 = vadd.f32 %v3399_v16, %v3064_v8  ;;  %v7277_v8 = vld [vmem:[%s7610_s3] ss:$0 sm:$0xff] }
 0x211   : > { %v2940_v14 = vpop.f32.mrf.mxu1  ;;  %v7260_v50 = vpop.f32.mrf.mxu3 }
 0x212   : > { %v4120_v59 = vadd.f32 %v7206_v17, %v3525_v12  ;;  %v3065_v34 = vadd.f32 %v2940_v14, %v6772_v30  ;;  %v4351_v17 = vrot.slane %v7258_v54, 3  ;;  %v7295_v54 = vld [vmem:[%s6429_s30 + $0x60] sm:$0xff] }
 0x214   : > { %v4458_v42 = vpop.f32.mrf.mxu0  ;;  %v4582_v3 = vadd.f32 %v4456_v36, %v4120_v59  ;;  %v4352_v12 = vsel %vm4331_vm6, %v4349_v23, %v4351_v17 }
 0x216   : > { %v4694_v36 = vmul.f32 %v7267_v51, %v4582_v3 }
 0x217   : > { %v3401_v26 = vpop.f32.mrf.mxu2 }
 0x218   : > { %v3526_v53 = vadd.f32 %v3401_v26, %v3065_v34  ;;  %v4734_v25 = vadd.f32 %v7277_v8, %v4694_v36  ;;  %v3296_v36 = vrot.slane %v7298_v41, 2 }
 0x219   : > { %v2943_v38 = vpop.f32.mrf.mxu1  ;;  %v7281_v14 = vpop.f32.mrf.mxu3 }
 0x21a   : > { %v4121_v30 = vadd.f32 %v7215_v4, %v3526_v53  ;;  %v3066_v23 = vadd.f32 %v2943_v38, %v6783_v24  ;;  %v4770_v3 = vmax.f32 %v4734_v25, 0.0  ;;  %v7302_v24 = vld [vmem:[%s6429_s30 + $0x68] sm:$0xff] }
 0x21c   : > { %v4461_v16 = vpop.f32.mrf.mxu0  ;;  %v4583_v0 = vadd.f32 %v4458_v42, %v4121_v30  ;;  %5644 = vmatmul.msk.bf16.gmra.mxu1 %vm393_vm0, %v2834_v55  ;;  %5758 = vmatmul.msk.bf16.gmra.mxu2 %vm393_vm0, %v3295_v29  ;;  %v2835_v29 = vrot.slane %v7295_v54, 2  ;;  %v3856_v30 = vrot.slane %v3854_v58, 2 }
 0x21e   : > { %v4695_v4 = vmul.f32 %v7267_v51, %v4583_v0  ;;  %5874 = vmatmul.msk.bf16.gmra.mxu3 %vm393_vm0, %v3852_v37  ;;  %v4353_v37 = vrot.slane %v7302_v24, 3  ;;  %v7337_v24 = vld [vmem:[%s6429_s30 + $0x70] sm:$0xff] }
 0x21f   : > { %5986 = vmatmul.msk.bf16.gmra.mxu0 %vm393_vm0, %v4352_v12  ;;  %v3404_v1 = vpop.f32.mrf.mxu2  ;;  %v3859_v12 = vrot.slane %v3857_v44, 3 }
 0x220   : > { %v4735_v27 = vadd.f32 %v7277_v8, %v4695_v4  ;;  %v3527_v59 = vadd.f32 %v3404_v1, %v3066_v23  ;;  %v2836_v23 = vsel %vm2813_vm5, %v2833_v15, %v2835_v29  ;;  %v3297_v1 = vsel %vm2813_vm5, %v3294_v13, %v3296_v36  ;;  %v6165_v13 = vld [vmem:[%s6429_s30 + $0x80] sm:$0xff] }
 0x221   : > { %v2945_v42 = vpop.f32.mrf.mxu1  ;;  %v7309_v38 = vpop.f32.mrf.mxu3 }
 0x222   : > { %v4771_v34 = vmax.f32 %v4735_v27, 0.0  ;;  %v4122_v26 = vadd.f32 %v7230_v60, %v3527_v59  ;;  %v3067_v0 = vadd.f32 %v2945_v42, %v6796_v57  ;;  %v3860_v27 = vor.u32 %v3859_v12, %v3856_v30 }
 0x224   : > { %v4463_v53 = vpop.f32.mrf.mxu0  ;;  %v6198_v55 = vpack.c.bf16 %v4771_v34, %v4770_v3  ;;  %v4584_v60 = vadd.f32 %v4461_v16, %v4122_v26  ;;  %v4354_v16 = vsel %vm4331_vm6, %v4351_v17, %v4353_v37  ;;  %v3861_v15 = vsel %vm3736_vm4, %v3851_v61, %v3860_v27 }
 0x225   : > { %v3863_v61 = vshrl.u32 %v6165_v13, 16 }
 0x226   : > { %6199 = vst [vmem:[%s7307_s12] sm:$0xff] %v6198_v55   ;;  %v4696_v59 = vmul.f32 %v7267_v51, %v4584_v60  ;;  %v3866_v55 = vshll.u32 %v6165_v13, 16 }
 0x227   : > { %v3406_v45 = vpop.f32.mrf.mxu2 }
 0x228   : > { %v3528_v25 = vadd.f32 %v3406_v45, %v3067_v0  ;;  %v4736_v58 = vadd.f32 %v7277_v8, %v4696_v59  ;;  %v3868_v59 = vrot.slane %v3866_v55, 3 }
 0x229   : > { %v2948_v4 = vpop.f32.mrf.mxu1  ;;  %v7321_v57 = vpop.f32.mrf.mxu3 }
 0x22a   : > { %v4123_v54 = vadd.f32 %v7239_v46, %v3528_v25  ;;  %v3068_v17 = vadd.f32 %v2948_v4, %v6807_v49  ;;  %v4772_v30 = vmax.f32 %v4736_v58, 0.0  ;;  %v7341_v49 = vld [vmem:[%s6429_s30 + $0x70] sm:$0xff] }
 0x22c   : > { %v4466_v41 = vpop.f32.mrf.mxu0  ;;  %v4585_v42 = vadd.f32 %v4463_v53, %v4123_v54  ;;  %5645 = vmatmul.msk.bf16.gmra.mxu1 %vm393_vm0, %v2836_v23  ;;  %5759 = vmatmul.msk.bf16.gmra.mxu2 %vm393_vm0, %v3297_v1  ;;  %v7334_v53 = vld [vmem:[%s6429_s30 + $0x68] sm:$0xff]  ;;  %v3298_v23 = vrot.slane %v7337_v24, 2  ;;  %v3865_v1 = vrot.slane %v3863_v61, 2 }
 0x22d   : > { %v2837_v4 = vrot.slane %v7334_v53, 2 }
 0x22e   : > { %v4697_v46 = vmul.f32 %v7267_v51, %v4585_v42  ;;  %5875 = vmatmul.msk.bf16.gmra.mxu3 %vm393_vm0, %v3861_v15  ;;  %v4355_v42 = vrot.slane %v7341_v49, 3 }
 0x22f   : > { %5987 = vmatmul.msk.bf16.gmra.mxu0 %vm393_vm0, %v4354_v16  ;;  %v3409_v44 = vpop.f32.mrf.mxu2  ;;  %v2838_v58 = vsel %vm2813_vm5, %v2835_v29, %v2837_v4 }
 0x230   : > { %v4737_v3 = vadd.f32 %v7277_v8, %v4697_v46  ;;  %v3529_v34 = vadd.f32 %v3409_v44, %v3068_v17  ;;  %v3299_v46 = vsel %vm2813_vm5, %v3296_v36, %v3298_v23  ;;  %v3869_v17 = vor.u32 %v3868_v59, %v3865_v1  ;;  %v6166_v36 = vld [vmem:[%s6429_s30 + $0x88] sm:$0xff] }
 0x231   : > { %v2950_v26 = vpop.f32.mrf.mxu1  ;;  %v7343_v45 = vpop.f32.mrf.mxu3 }
 0x232   : > { %v4773_v12 = vmax.f32 %v4737_v3, 0.0  ;;  %v4124_v60 = vadd.f32 %v7260_v50, %v3529_v34  ;;  %v3069_v16 = vadd.f32 %v2950_v26, %v6823_v22  ;;  %v3870_v29 = vsel %vm3736_vm4, %v3860_v27, %v3869_v17 }
 0x233   : > { %v3872_v27 = vshrl.u32 %v6166_v36, 16 }
 0x234   : > { %v4468_v0 = vpop.f32.mrf.mxu0  ;;  %v6203_v25 = vpack.c.bf16 %v4773_v12, %v4772_v30  ;;  %v4586_v54 = vadd.f32 %v4466_v41, %v4124_v60  ;;  %v4356_v41 = vsel %vm4331_vm6, %v4353_v37, %v4355_v42  ;;  %v7368_v12 = vld [vmem:[%s6429_s30 + $0x70] sm:$0xff]  ;;  %v7371_v60 = vld [vmem:[%s6429_s30 + $0x78] sm:$0xff] }
 0x236   : > { %6285 = vst [vmem:[%s7307_s12 + $0x8] sm:$0xff] %v6203_v25   ;;  %v4698_v44 = vmul.f32 %v7267_v51, %v4586_v54 }
 0x237   : > { %v3411_v15 = vpop.f32.mrf.mxu2 }
 0x238   : > { %v3530_v50 = vadd.f32 %v3411_v15, %v3069_v16  ;;  %v4738_v53 = vadd.f32 %v7277_v8, %v4698_v44  ;;  %v2839_v15 = vrot.slane %v7368_v12, 2 }
 0x239   : > { %v2953_v13 = vpop.f32.mrf.mxu1  ;;  %v7355_v22 = vpop.f32.mrf.mxu3 }
 0x23a   : > { %v4125_v3 = vadd.f32 %v7281_v14, %v3530_v50  ;;  %v3070_v37 = vadd.f32 %v2953_v13, %v6845_v21  ;;  %v4774_v49 = vmax.f32 %v4738_v53, 0.0  ;;  %v7375_v21 = vld [vmem:[%s6429_s30 + $0x78] sm:$0xff]  ;;  %v3300_v50 = vrot.slane %v7371_v60, 2 }
 0x23b   : > { %v3874_v13 = vrot.slane %v3872_v27, 2 }
 0x23c   : > { %v4471_v34 = vpop.f32.mrf.mxu0  ;;  %v4587_v26 = vadd.f32 %v4468_v0, %v4125_v3  ;;  %5646 = vmatmul.msk.bf16.gmra.mxu1 %vm393_vm0, %v2838_v58  ;;  %5760 = vmatmul.msk.bf16.gmra.mxu2 %vm393_vm0, %v3299_v46  ;;  %v3875_v0 = vshll.u32 %v6166_v36, 16  ;;  %v4357_v3 = vrot.slane %v7375_v21, 3  ;;  %v3301_v36 = vsel %vm2813_vm5, %v3298_v23, %v3300_v50  ;;  %v6167_v23 = vld [vmem:[%s6429_s30 + $0x90] sm:$0xff] }
 0x23e   : > { %v4699_v14 = vmul.f32 %v7267_v51, %v4587_v26  ;;  %5876 = vmatmul.msk.bf16.gmra.mxu3 %vm393_vm0, %v3870_v29  ;;  %v3877_v58 = vrot.slane %v3875_v0, 3  ;;  %v2840_v29 = vsel %vm2813_vm5, %v2837_v4, %v2839_v15  ;;  %v7402_v0 = vld [vmem:[%s6429_s30 + $0x78] sm:$0xff] }
 0x23f   : > { %5988 = vmatmul.msk.bf16.gmra.mxu0 %vm393_vm0, %v4356_v41  ;;  %v3414_v24 = vpop.f32.mrf.mxu2 }
 0x240   : > { %v4739_v61 = vadd.f32 %v7277_v8, %v4699_v14  ;;  %v3531_v55 = vadd.f32 %v3414_v24, %v3070_v37  ;;  %v3878_v53 = vor.u32 %v3877_v58, %v3874_v13 }
 0x241   : > { %v2955_v30 = vpop.f32.mrf.mxu1  ;;  %v7377_v54 = vpop.f32.mrf.mxu3 }
 0x242   : > { %v4775_v25 = vmax.f32 %v4739_v61, 0.0  ;;  %v4126_v1 = vadd.f32 %v7309_v38, %v3531_v55  ;;  %v3071_v44 = vadd.f32 %v2955_v30, %v6865_v31  ;;  %v3879_v4 = vsel %vm3736_vm4, %v3869_v17, %v3878_v53 }
 0x243   : > { %v3881_v17 = vshrl.u32 %v6167_v23, 16 }
 0x244   : > { %v4473_v59 = vpop.f32.mrf.mxu0  ;;  %v6208_v16 = vpack.c.bf16 %v4775_v25, %v4774_v49  ;;  %v4588_v46 = vadd.f32 %v4471_v34, %v4126_v1  ;;  %v4358_v34 = vsel %vm4331_vm6, %v4355_v42, %v4357_v3  ;;  %v7405_v49 = vld [vmem:[%s6429_s30 + $0x80] sm:$0xff]  ;;  %v3884_v25 = vshll.u32 %v6167_v23, 16 }
 0x246   : > { %6286 = vst [vmem:[%s7307_s12 + $0x10] sm:$0xff] %v6208_v16   ;;  %v4700_v14 = vmul.f32 %v7267_v51, %v4588_v46  ;;  %v2841_v46 = vrot.slane %v7402_v0, 2 }
 0x247   : > { %v3416_v41 = vpop.f32.mrf.mxu2 }
 0x248   : > { %v3532_v38 = vadd.f32 %v3416_v41, %v3071_v44  ;;  %v4740_v55 = vadd.f32 %v7277_v8, %v4700_v14  ;;  %v3302_v44 = vrot.slane %v7405_v49, 2  ;;  %v3883_v41 = vrot.slane %v3881_v17, 2 }
 0x249   : > { %v2958_v26 = vpop.f32.mrf.mxu1  ;;  %v7389_v31 = vpop.f32.mrf.mxu3 }
 0x24a   : > { %v4127_v37 = vadd.f32 %v7321_v57, %v3532_v38  ;;  %v3072_v42 = vadd.f32 %v2958_v26, %v6880_v19  ;;  %v4776_v1 = vmax.f32 %v4740_v55, 0.0  ;;  %v7409_v19 = vld [vmem:[%s6429_s30 + $0x80] sm:$0xff]  ;;  %v3886_v38 = vrot.slane %v3884_v25, 3 }
 0x24b   : > { %v4359_v14 = vrot.slane %v7409_v19, 3 }
 0x24c   : > { %v4476_v24 = vpop.f32.mrf.mxu0  ;;  %v4589_v61 = vadd.f32 %v4473_v59, %v4127_v37  ;;  %5647 = vmatmul.msk.bf16.gmra.mxu1 %vm393_vm0, %v2840_v29  ;;  %5761 = vmatmul.msk.bf16.gmra.mxu2 %vm393_vm0, %v3301_v36  ;;  %v7623_v29 = vld [vmem:[#allocation6_spill] sm:$0xff]  ;;  %v3887_v23 = vor.u32 %v3886_v38, %v3883_v41  ;;  %v7443_v38 = vld [vmem:[%s6429_s30 + $0x88] sm:$0xff] }
 0x24e   : > { %v4701_v57 = vmul.f32 %v7267_v51, %v4589_v61  ;;  %5877 = vmatmul.msk.bf16.gmra.mxu3 %vm393_vm0, %v3879_v4  ;;  %v2842_v61 = vsel %vm2813_vm5, %v2839_v15, %v2841_v46  ;;  %v3303_v4 = vsel %vm2813_vm5, %v3300_v50, %v3302_v44  ;;  %v3888_v15 = vsel %vm3736_vm4, %v3878_v53, %v3887_v23  ;;  %v6168_v50 = vld [vmem:[%s6429_s30 + $0x98] sm:$0xff] }
 0x24f   : > { %5989 = vmatmul.msk.bf16.gmra.mxu0 %vm393_vm0, %v4358_v34  ;;  %v3419_v30 = vpop.f32.mrf.mxu2  ;;  %v3890_v53 = vshrl.u32 %v6168_v50, 16 }
 0x250   : > { %v4741_v12 = vadd.f32 %v7277_v8, %v4701_v57  ;;  %v3533_v60 = vadd.f32 %v3419_v30, %v3072_v42 }
 0x251   : > { %v2960_v27 = vpop.f32.mrf.mxu1  ;;  %v7411_v13 = vpop.f32.mrf.mxu3 }
 0x252   : > { %v4777_v59 = vmax.f32 %v4741_v12, 0.0  ;;  %v4128_v21 = vadd.f32 %v7343_v45, %v3533_v60  ;;  %v3073_v36 = vadd.f32 %v2960_v27, %v7623_v29 }
 0x254   : > { %v4478_v16 = vpop.f32.mrf.mxu0  ;;  %v6213_v58 = vpack.c.bf16 %v4777_v59, %v4776_v1  ;;  %v4590_v26 = vadd.f32 %v4476_v24, %v4128_v21  ;;  %v4360_v24 = vsel %vm4331_vm6, %v4357_v3, %v4359_v14  ;;  %v7624_v3 = vld [vmem:[#allocation7_spill] sm:$0xff]  ;;  %v7439_v59 = vld [vmem:[%s6429_s30 + $0x88] sm:$0xff]  ;;  %v3893_v21 = vshll.u32 %v6168_v50, 16 }
 0x255   : > { %v7436_v1 = vld [vmem:[%s6429_s30 + $0x80] sm:$0xff] }
 0x256   : > { %6287 = vst [vmem:[%s7307_s12 + $0x18] sm:$0xff] %v6213_v58   ;;  %v4702_v55 = vmul.f32 %v7267_v51, %v4590_v26 }
 0x257   : > { %v3421_v37 = vpop.f32.mrf.mxu2 }
 0x258   : > { %v3534_v45 = vadd.f32 %v3421_v37, %v3073_v36  ;;  %v4742_v60 = vadd.f32 %v7277_v8, %v4702_v55  ;;  %v2843_v36 = vrot.slane %v7436_v1, 2  ;;  %v3304_v37 = vrot.slane %v7439_v59, 2  ;;  %v7626_v1 = vld [vmem:[#allocation9_spill] sm:$0xff] }
 0x259   : > { %v2963_v34 = vpop.f32.mrf.mxu1  ;;  %v7423_v30 = vpop.f32.mrf.mxu3 }
 0x25a   : > { %v4129_v57 = vadd.f32 %v7355_v22, %v3534_v45  ;;  %v3074_v27 = vadd.f32 %v2963_v34, %v7624_v3  ;;  %v3892_v45 = vrot.slane %v3890_v53, 2  ;;  %v3895_v34 = vrot.slane %v3893_v21, 3 }
 0x25b   : > { %v3305_v50 = vsel %vm2813_vm5, %v3302_v44, %v3304_v37 }
 0x25c   : > { %v4481_v42 = vpop.f32.mrf.mxu0  ;;  %v4591_v12 = vadd.f32 %v4478_v16, %v4129_v57  ;;  %5648 = vmatmul.msk.bf16.gmra.mxu1 %vm393_vm0, %v2842_v61  ;;  %5762 = vmatmul.msk.bf16.gmra.mxu2 %vm393_vm0, %v3303_v4  ;;  %v4778_v16 = vmax.f32 %v4742_v60, 0.0  ;;  %v7625_v4 = vld [vmem:[#allocation8_spill] sm:$0xff]  ;;  %v4361_v57 = vrot.slane %v7443_v38, 3  ;;  %v3896_v60 = vor.u32 %v3895_v34, %v3892_v45 }
 0x25e   : > { %v4703_v22 = vmul.f32 %v7267_v51, %v4591_v12  ;;  %5878 = vmatmul.msk.bf16.gmra.mxu3 %vm393_vm0, %v3888_v15  ;;  %v2844_v15 = vsel %vm2813_vm5, %v2841_v46, %v2843_v36  ;;  %v3897_v46 = vsel %vm3736_vm4, %v3887_v23, %v3896_v60 }
 0x25f   : > { %5990 = vmatmul.msk.bf16.gmra.mxu0 %vm393_vm0, %v4360_v24  ;;  %v3424_v0 = vpop.f32.mrf.mxu2 }
 0x260   : > { %v4743_v49 = vadd.f32 %v7277_v8, %v4703_v22  ;;  %v3535_v17 = vadd.f32 %v3424_v0, %v3074_v27  ;;  %v4362_v0 = vsel %vm4331_vm6, %v4359_v14, %v4361_v57 }
 0x261   : > { %v2965_v25 = vpop.f32.mrf.mxu1  ;;  %v7445_v26 = vpop.f32.mrf.mxu3 }
 0x262   : > { %v4779_v19 = vmax.f32 %v4743_v49, 0.0  ;;  %v4130_v58 = vadd.f32 %v7377_v54, %v3535_v17  ;;  %v3075_v55 = vadd.f32 %v2965_v25, %v7625_v4  ;;  %v6189_v4 = vld [vmem:[%s6429_s30 + $0x90] sm:$0xff] }
 0x264   : > { %v4483_v41 = vpop.f32.mrf.mxu0  ;;  %v6218_v29 = vpack.c.bf16 %v4779_v19, %v4778_v16  ;;  %v4592_v61 = vadd.f32 %v4481_v42, %v4130_v58  ;;  %v3633_v42 = vld [vmem:[%s6429_s30 + $0xa0] sm:$0x7]  ;;  %v7470_v58 = vld [vmem:[%s6429_s30 + $0x88] sm:$0xff] }
 0x265   : > { %v3716_v17 = vunpack.c.l.b16 %v3633_v42  ;;  %v4363_v42 = vrot.slane %v6189_v4, 3 }
 0x266   : > { %6288 = vst [vmem:[%s7307_s12 + $0x20] sm:$0xff] %v6218_v29   ;;  %v4704_v22 = vmul.f32 %v7267_v51, %v4592_v61 }
 0x267   : > { %v3426_v54 = vpop.f32.mrf.mxu2  ;;  %v3735_v44 = vpack.c.b16 %v3716_v17, %v3716_v17 }
 0x268   : > { %v3536_v24 = vadd.f32 %v3426_v54, %v3075_v55 }
 0x269   : > { %v2968_v12 = vpop.f32.mrf.mxu1  ;;  %v7458_v49 = vpop.f32.mrf.mxu3  ;;  %v3899_v23 = vshrl.u32 %v3735_v44, 16  ;;  %v3902_v38 = vshll.u32 %v3735_v44, 16 }
 0x26a   : > { %v4131_v3 = vadd.f32 %v7389_v31, %v3536_v24  ;;  %v4744_v31 = vadd.f32 %v7277_v8, %v4704_v22  ;;  %v3076_v59 = vadd.f32 %v2968_v12, %v7626_v1  ;;  %v2845_v24 = vrot.slane %v7470_v58, 2 }
 0x26c   : > { %v4486_v27 = vpop.f32.mrf.mxu0  ;;  %v4593_v25 = vadd.f32 %v4483_v41, %v4131_v3  ;;  %5649 = vmatmul.msk.bf16.gmra.mxu1 %vm393_vm0, %v2844_v15  ;;  %5763 = vmatmul.msk.bf16.gmra.mxu2 %vm393_vm0, %v3305_v50  ;;  %v7473_v41 = vld [vmem:[%s6429_s30 + $0x90] sm:$0xff]  ;;  %v4780_v29 = vmax.f32 %v4744_v31, 0.0  ;;  %v3901_v15 = vrot.slane %v3899_v23, 2  ;;  %v3904_v50 = vrot.slane %v3902_v38, 3  ;;  %v7627_v3 = vld [vmem:[#allocation10_spill] sm:$0xff] }
 0x26d   : > { %v3306_v12 = vrot.slane %v7473_v41, 2  ;;  %v6124_v23 = vld [vmem:[%s6429_s30 + $0x90] sm:$0xff]  ;;  %v6146_v38 = vld [vmem:[%s6429_s30 + $0x98] sm:$0xff] }
 0x26e   : > { %v4705_v14 = vmul.f32 %v7267_v51, %v4593_v25  ;;  %5879 = vmatmul.msk.bf16.gmra.mxu3 %vm393_vm0, %v3897_v46  ;;  %v3905_v31 = vor.u32 %v3904_v50, %v3901_v15  ;;  %v3308_v15 = vrot.slane %v6146_v38, 2 }
 0x26f   : > { %5991 = vmatmul.msk.bf16.gmra.mxu0 %vm393_vm0, %v4362_v0  ;;  %v3429_v53 = vpop.f32.mrf.mxu2  ;;  %v3307_v44 = vsel %vm2813_vm5, %v3304_v37, %v3306_v12 }
 0x270   : > { %v4745_v21 = vadd.f32 %v7277_v8, %v4705_v14  ;;  %v3537_v16 = vadd.f32 %v3429_v53, %v3076_v59  ;;  %v4364_v53 = vsel %vm4331_vm6, %v4361_v57, %v4363_v42 }
 0x271   : > { %v2970_v19 = vpop.f32.mrf.mxu1  ;;  %v7477_v55 = vpop.f32.mrf.mxu3 }
 0x272   : > { %v4781_v45 = vmax.f32 %v4745_v21, 0.0  ;;  %v4132_v34 = vadd.f32 %v7411_v13, %v3537_v16  ;;  %v3077_v0 = vadd.f32 %v2970_v19, %v7627_v3  ;;  %v2846_v13 = vsel %vm2813_vm5, %v2843_v36, %v2845_v24 }
 0x273   : > { %v3906_v36 = vsel %vm3736_vm4, %v3896_v60, %v3905_v31 }
 0x274   : > { %v4488_v61 = vpop.f32.mrf.mxu0  ;;  %v6223_v54 = vpack.c.bf16 %v4781_v45, %v4780_v29  ;;  %v4594_v22 = vadd.f32 %v4486_v27, %v4132_v34 }
 0x276   : > { %6289 = vst [vmem:[%s7307_s12 + $0x28] sm:$0xff] %v6223_v54   ;;  %v4706_v14 = vmul.f32 %v7267_v51, %v4594_v22 }
 0x277   : > { %v3431_v17 = vpop.f32.mrf.mxu2 }
 0x278   : > { %v3538_v25 = vadd.f32 %v3431_v17, %v3077_v0  ;;  %v4746_v37 = vadd.f32 %v7277_v8, %v4706_v14 }
 0x279   : > { %v2973_v46 = vpop.f32.mrf.mxu1  ;;  %v7488_v27 = vpop.f32.mrf.mxu3 }
 0x27a   : > { %v4133_v1 = vadd.f32 %v7423_v30, %v3538_v25  ;;  %v3078_v16 = vadd.f32 %v2973_v46, %v6975_v7  ;;  %v4782_v29 = vmax.f32 %v4746_v37, 0.0  ;;  %v2847_v7 = vrot.slane %v6124_v23, 2 }
 0x27b   : > { %v3309_v46 = vsel %vm2813_vm5, %v3306_v12, %v3308_v15 }
 0x27c   : > { %v4491_v59 = vpop.f32.mrf.mxu0  ;;  %v4595_v21 = vadd.f32 %v4488_v61, %v4133_v1  ;;  %5650 = vmatmul.msk.bf16.gmra.mxu1 %vm393_vm0, %v2846_v13  ;;  %5764 = vmatmul.msk.bf16.gmra.mxu2 %vm393_vm0, %v3307_v44  ;;  %v6190_v61 = vld [vmem:[%s6429_s30 + $0x98] sm:$0xff] }
 0x27d   : > { %v4365_v3 = vrot.slane %v6190_v61, 3  ;;  %v2710_v1 = vld [vmem:[%s6429_s30 + $0x98] sm:$0x3] }
 0x27e   : > { %v4707_v30 = vmul.f32 %v7267_v51, %v4595_v21  ;;  %5880 = vmatmul.msk.bf16.gmra.mxu3 %vm393_vm0, %v3906_v36 }
 0x27f   : > { %5992 = vmatmul.msk.bf16.gmra.mxu0 %vm393_vm0, %v4364_v53  ;;  %v3434_v57 = vpop.f32.mrf.mxu2  ;;  %v4366_v14 = vsel %vm4331_vm6, %v4363_v42, %v4365_v3  ;;  %v3172_v53 = vld [vmem:[%s6429_s30 + $0xa0] sm:$0x3] }
 0x280   : > { %v4747_v19 = vadd.f32 %v7277_v8, %v4707_v30  ;;  %v3539_v58 = vadd.f32 %v3434_v57, %v3078_v16  ;;  %v3255_v12 = vunpack.c.l.b16 %v3172_v53 }
 0x281   : > { %v2975_v41 = vpop.f32.mrf.mxu1  ;;  %v7503_v4 = vpop.f32.mrf.mxu3 }
 0x282   : > { %v4783_v45 = vmax.f32 %v4747_v19, 0.0  ;;  %v4134_v60 = vadd.f32 %v7445_v26, %v3539_v58  ;;  %v3079_v22 = vadd.f32 %v2975_v41, %v6991_v63  ;;  %v2848_v26 = vsel %vm2813_vm5, %v2845_v24, %v2847_v7 }
 0x283   : > { %v2793_v24 = vunpack.c.l.b16 %v2710_v1  ;;  %v3274_v41 = vpack.c.b16 %v3255_v12, %v3255_v12 }
 0x284   : > { %v4493_v34 = vpop.f32.mrf.mxu0  ;;  %v6228_v54 = vpack.c.bf16 %v4783_v45, %v4782_v29  ;;  %v4596_v50 = vadd.f32 %v4491_v59, %v4134_v60  ;;  %v4228_v59 = vld [vmem:[%s6429_s30 + $0xa0] sm:$0x7] }
 0x285   : > { %v4311_v37 = vunpack.c.l.b16 %v4228_v59  ;;  %v2812_v58 = vpack.c.b16 %v2793_v24, %v2793_v24 }
 0x286   : > { %6290 = vst [vmem:[%s7307_s12 + $0x30] sm:$0xff] %v6228_v54   ;;  %v4708_v13 = vmul.f32 %v7267_v51, %v4596_v50  ;;  %v3310_v50 = vrot.slane %v3274_v41, 2 }
 0x287   : > { %v3436_v0 = vpop.f32.mrf.mxu2  ;;  %v4330_v60 = vpack.c.b16 %v4311_v37, %v4311_v37  ;;  %v2849_v54 = vrot.slane %v2812_v58, 2 }
 0x288   : > { %v3540_v17 = vadd.f32 %v3436_v0, %v3079_v22  ;;  %v4748_v36 = vadd.f32 %v7277_v8, %v4708_v13  ;;  %v3311_v13 = vsel %vm2813_vm5, %v3308_v15, %v3310_v50 }
 0x289   : > { %v2978_v25 = vpop.f32.mrf.mxu1  ;;  %v7515_v21 = vpop.f32.mrf.mxu3  ;;  %v4367_v0 = vrot.slane %v4330_v60, 3 }
 0x28a   : > { %v4135_v44 = vadd.f32 %v7458_v49, %v3540_v17  ;;  %v3080_v42 = vadd.f32 %v2978_v25, %v7002_v43  ;;  %v4784_v23 = vmax.f32 %v4748_v36, 0.0 }
 0x28b   : > { %v4368_v1 = vsel %vm4331_vm6, %v4365_v3, %v4367_v0 }
 0x28c   : > { %v4496_v31 = vpop.f32.mrf.mxu0  ;;  %v4597_v63 = vadd.f32 %v4493_v34, %v4135_v44  ;;  %5651 = vmatmul.msk.bf16.gmra.mxu1 %vm393_vm0, %v2848_v26  ;;  %5765 = vmatmul.msk.bf16.gmra.mxu2 %vm393_vm0, %v3309_v46  ;;  %v2850_v46 = vsel %vm2813_vm5, %v2847_v7, %v2849_v54 }
 0x28e   : > { %v4709_v49 = vmul.f32 %v7267_v51, %v4597_v63 }
 0x28f   : > { %5993 = vmatmul.msk.bf16.gmra.mxu0 %vm393_vm0, %v4366_v14  ;;  %v3439_v30 = vpop.f32.mrf.mxu2 }
 0x290   : > { %v4749_v16 = vadd.f32 %v7277_v8, %v4709_v49  ;;  %v3541_v57 = vadd.f32 %v3439_v30, %v3080_v42 }
 0x291   : > { %v2980_v19 = vpop.f32.mrf.mxu1  ;;  %v4044_v34 = vpop.f32.mrf.mxu3 }
 0x292   : > { %v4785_v38 = vmax.f32 %v4749_v16, 0.0  ;;  %v4136_v29 = vadd.f32 %v7477_v55, %v3541_v57  ;;  %v3081_v22 = vadd.f32 %v2980_v19, %v7015_v56 }
 0x294   : > { %v4498_v45 = vpop.f32.mrf.mxu0  ;;  %v6233_v61 = vpack.c.bf16 %v4785_v38, %v4784_v23  ;;  %v4598_v43 = vadd.f32 %v4496_v31, %v4136_v29 }
 0x296   : > { %6291 = vst [vmem:[%s7307_s12 + $0x38] sm:$0xff] %v6233_v61   ;;  %v4710_v55 = vmul.f32 %v7267_v51, %v4598_v43 }
 0x297   : > { %v3441_v17 = vpop.f32.mrf.mxu2 }
 0x298   : > { %v3542_v25 = vadd.f32 %v3441_v17, %v3081_v22  ;;  %v4750_v7 = vadd.f32 %v7277_v8, %v4710_v55 }
 0x299   : > { %v2983_v26 = vpop.f32.mrf.mxu1  ;;  %v4046_v56 = vpop.f32.mrf.mxu3 }
 0x29a   : > { %v4137_v44 = vadd.f32 %v7488_v27, %v3542_v25  ;;  %v3082_v31 = vadd.f32 %v2983_v26, %v7039_v10  ;;  %v4786_v24 = vmax.f32 %v4750_v7, 0.0 }
 0x29c   : > { %v4501_v14 = vpop.f32.mrf.mxu0  ;;  %v4599_v53 = vadd.f32 %v4498_v45, %v4137_v44  ;;  %5652 = vmatmul.msk.bf16.gmra.mxu1 %vm393_vm0, %v2850_v46  ;;  %5766 = vmatmul.msk.bf16.gmra.mxu2 %vm393_vm0, %v3311_v13 }
 0x29e   : > { %v4711_v15 = vmul.f32 %v7267_v51, %v4599_v53 }
 0x29f   : > { %5994 = vmatmul.msk.bf16.gmra.mxu0 %vm393_vm0, %v4368_v1  ;;  %v3444_v59 = vpop.f32.mrf.mxu2 }
 0x2a0   : > { %v4751_v27 = vadd.f32 %v7277_v8, %v4711_v15  ;;  %v3543_v63 = vadd.f32 %v3444_v59, %v3082_v31 }
 0x2a1   : > { %v2985_v3 = vpop.f32.mrf.mxu1  ;;  %v4049_v57 = vpop.f32.mrf.mxu3 }
 0x2a2   : > { %v4787_v12 = vmax.f32 %v4751_v27, 0.0  ;;  %v4138_v36 = vadd.f32 %v7503_v4, %v3543_v63  ;;  %v3083_v30 = vadd.f32 %v2985_v3, %v7051_v48 }
 0x2a4   : > { %v4503_v49 = vpop.f32.mrf.mxu0  ;;  %v6238_v42 = vpack.c.bf16 %v4787_v12, %v4786_v24  ;;  %v4600_v37 = vadd.f32 %v4501_v14, %v4138_v36 }
 0x2a6   : > { %6292 = vst [vmem:[%s7307_s12 + $0x40] sm:$0xff] %v6238_v42   ;;  %v4712_v10 = vmul.f32 %v7267_v51, %v4600_v37 }
 0x2a7   : > { %v3446_v16 = vpop.f32.mrf.mxu2 }
 0x2a8   : > { %v3544_v19 = vadd.f32 %v3446_v16, %v3083_v30  ;;  %v4752_v29 = vadd.f32 %v7277_v8, %v4712_v10 }
 0x2a9   : > { %v2988_v58 = vpop.f32.mrf.mxu1  ;;  %v4051_v50 = vpop.f32.mrf.mxu3 }
 0x2aa   : > { %v4139_v41 = vadd.f32 %v7515_v21, %v3544_v19  ;;  %v3084_v45 = vadd.f32 %v2988_v58, %v7064_v40  ;;  %v4788_v43 = vmax.f32 %v4752_v29, 0.0 }
 0x2ac   : > { %v4506_v23 = vpop.f32.mrf.mxu0  ;;  %v4601_v38 = vadd.f32 %v4503_v49, %v4139_v41 }
 0x2ae   : > { %v4713_v4 = vmul.f32 %v7267_v51, %v4601_v38 }
 0x2af   : > { %v3449_v60 = vpop.f32.mrf.mxu2 }
 0x2b0   : > { %v4753_v48 = vadd.f32 %v7277_v8, %v4713_v4  ;;  %v3545_v61 = vadd.f32 %v3449_v60, %v3084_v45 }
 0x2b1   : > { %v2990_v54 = vpop.f32.mrf.mxu1  ;;  %v4054_v1 = vpop.f32.mrf.mxu3 }
 0x2b2   : > { %v4789_v22 = vmax.f32 %v4753_v48, 0.0  ;;  %v4140_v0 = vadd.f32 %v4044_v34, %v3545_v61  ;;  %v3085_v26 = vadd.f32 %v2990_v54, %v7075_v39 }
 0x2b4   : > { %v4508_v17 = vpop.f32.mrf.mxu0  ;;  %v6243_v21 = vpack.c.bf16 %v4789_v22, %v4788_v43  ;;  %v4602_v25 = vadd.f32 %v4506_v23, %v4140_v0 }
 0x2b6   : > { %6293 = vst [vmem:[%s7307_s12 + $0x48] sm:$0xff] %v6243_v21   ;;  %v4714_v40 = vmul.f32 %v7267_v51, %v4602_v25 }
 0x2b7   : > { %v3451_v46 = vpop.f32.mrf.mxu2 }
 0x2b8   : > { %v3546_v13 = vadd.f32 %v3451_v46, %v3085_v26  ;;  %v4754_v7 = vadd.f32 %v7277_v8, %v4714_v40 }
 0x2b9   : > { %v2993_v55 = vpop.f32.mrf.mxu1  ;;  %v4056_v36 = vpop.f32.mrf.mxu3 }
 0x2ba   : > { %v4141_v44 = vadd.f32 %v4046_v56, %v3546_v13  ;;  %v3086_v15 = vadd.f32 %v2993_v55, %v7088_v18  ;;  %v4790_v63 = vmax.f32 %v4754_v7, 0.0 }
 0x2bc   : > { %v4511_v14 = vpop.f32.mrf.mxu0  ;;  %v4603_v53 = vadd.f32 %v4508_v17, %v4141_v44 }
 0x2be   : > { %v4715_v34 = vmul.f32 %v7267_v51, %v4603_v53 }
 0x2bf   : > { %v3454_v31 = vpop.f32.mrf.mxu2 }
 0x2c0   : > { %v4755_v59 = vadd.f32 %v7277_v8, %v4715_v34  ;;  %v3547_v39 = vadd.f32 %v3454_v31, %v3086_v15 }
 0x2c1   : > { %v2995_v27 = vpop.f32.mrf.mxu1  ;;  %v4059_v29 = vpop.f32.mrf.mxu3 }
 0x2c2   : > { %v4791_v3 = vmax.f32 %v4755_v59, 0.0  ;;  %v4142_v24 = vadd.f32 %v4049_v57, %v3547_v39  ;;  %v3087_v42 = vadd.f32 %v2995_v27, %v7099_v2 }
 0x2c4   : > { %v4513_v12 = vpop.f32.mrf.mxu0  ;;  %v6248_v56 = vpack.c.bf16 %v4791_v3, %v4790_v63  ;;  %v4604_v49 = vadd.f32 %v4511_v14, %v4142_v24 }
 0x2c6   : > { %6294 = vst [vmem:[%s7307_s12 + $0x50] sm:$0xff] %v6248_v56   ;;  %v4716_v18 = vmul.f32 %v7267_v51, %v4604_v49 }
 0x2c7   : > { %v3456_v37 = vpop.f32.mrf.mxu2 }
 0x2c8   : > { %v3548_v30 = vadd.f32 %v3456_v37, %v3087_v42  ;;  %v4756_v41 = vadd.f32 %v7277_v8, %v4716_v18 }
 0x2c9   : > { %v2998_v16 = vpop.f32.mrf.mxu1  ;;  %v4061_v25 = vpop.f32.mrf.mxu3 }
 0x2ca   : > { %v4143_v19 = vadd.f32 %v4051_v50, %v3548_v30  ;;  %v3088_v23 = vadd.f32 %v2998_v16, %v7112_v32  ;;  %v4792_v60 = vmax.f32 %v4756_v41, 0.0 }
 0x2cc   : > { %v4516_v58 = vpop.f32.mrf.mxu0  ;;  %v4605_v10 = vadd.f32 %v4513_v12, %v4143_v19 }
 0x2ce   : > { %v4717_v57 = vmul.f32 %v7267_v51, %v4605_v10 }
 0x2cf   : > { %v3459_v38 = vpop.f32.mrf.mxu2 }
 0x2d0   : > { %v4757_v4 = vadd.f32 %v7277_v8, %v4717_v57  ;;  %v3549_v2 = vadd.f32 %v3459_v38, %v3088_v23 }
 0x2d1   : > { %v3000_v45 = vpop.f32.mrf.mxu1  ;;  %v4064_v59 = vpop.f32.mrf.mxu3 }
 0x2d2   : > { %v4793_v48 = vmax.f32 %v4757_v4, 0.0  ;;  %v4144_v61 = vadd.f32 %v4054_v1, %v3549_v2  ;;  %v3089_v22 = vadd.f32 %v3000_v45, %v7123_v35 }
 0x2d4   : > { %v4518_v54 = vpop.f32.mrf.mxu0  ;;  %v6253_v50 = vpack.c.bf16 %v4793_v48, %v4792_v60  ;;  %v4606_v43 = vadd.f32 %v4516_v58, %v4144_v61 }
 0x2d6   : > { %6295 = vst [vmem:[%s7307_s12 + $0x58] sm:$0xff] %v6253_v50   ;;  %v4718_v32 = vmul.f32 %v7267_v51, %v4606_v43 }
 0x2d7   : > { %v3461_v0 = vpop.f32.mrf.mxu2 }
 0x2d8   : > { %v3550_v17 = vadd.f32 %v3461_v0, %v3089_v22  ;;  %v4758_v55 = vadd.f32 %v7277_v8, %v4718_v32 }
 0x2d9   : > { %v3003_v21 = vpop.f32.mrf.mxu1  ;;  %v4066_v42 = vpop.f32.mrf.mxu3 }
 0x2da   : > { %v4145_v26 = vadd.f32 %v4056_v36, %v3550_v17  ;;  %v3090_v44 = vadd.f32 %v3003_v21, %v7136_v6  ;;  %v4794_v7 = vmax.f32 %v4758_v55, 0.0 }
 0x2dc   : > { %v4521_v46 = vpop.f32.mrf.mxu0  ;;  %v4607_v13 = vadd.f32 %v4518_v54, %v4145_v26 }
 0x2de   : > { %v4719_v40 = vmul.f32 %v7267_v51, %v4607_v13 }
 0x2df   : > { %v3464_v14 = vpop.f32.mrf.mxu2 }
 0x2e0   : > { %v4759_v1 = vadd.f32 %v7277_v8, %v4719_v40  ;;  %v3551_v35 = vadd.f32 %v3464_v14, %v3090_v44 }
 0x2e1   : > { %v3005_v53 = vpop.f32.mrf.mxu1  ;;  %v4069_v45 = vpop.f32.mrf.mxu3 }
 0x2e2   : > { %v4795_v34 = vmax.f32 %v4759_v1, 0.0  ;;  %v4146_v15 = vadd.f32 %v4059_v29, %v3551_v35  ;;  %v3091_v63 = vadd.f32 %v3005_v53, %v7147_v9 }
 0x2e4   : > { %v4523_v31 = vpop.f32.mrf.mxu0  ;;  %v6258_v39 = vpack.c.bf16 %v4795_v34, %v4794_v7  ;;  %v4608_v27 = vadd.f32 %v4521_v46, %v4146_v15 }
 0x2e6   : > { %6296 = vst [vmem:[%s7307_s12 + $0x60] sm:$0xff] %v6258_v39   ;;  %v4720_v6 = vmul.f32 %v7267_v51, %v4608_v27 }
 0x2e7   : > { %v3466_v3 = vpop.f32.mrf.mxu2 }
 0x2e8   : > { %v3552_v24 = vadd.f32 %v3466_v3, %v3091_v63  ;;  %v4760_v37 = vadd.f32 %v7277_v8, %v4720_v6 }
 0x2e9   : > { %v3008_v12 = vpop.f32.mrf.mxu1  ;;  %v4071_v32 = vpop.f32.mrf.mxu3 }
 0x2ea   : > { %v4147_v56 = vadd.f32 %v4061_v25, %v3552_v24  ;;  %v3092_v16 = vadd.f32 %v3008_v12, %v7160_v28  ;;  %v4796_v10 = vmax.f32 %v4760_v37, 0.0 }
 0x2ec   : > { %v4526_v36 = vpop.f32.mrf.mxu0  ;;  %v4609_v49 = vadd.f32 %v4523_v31, %v4147_v56  ;;  %v6343_v31 = vld [vmem:[%s7610_s3] ss:$0 sm:$0xff] }
 0x2ee   : > { %v4721_v30 = vmul.f32 %v7267_v51, %v4609_v49 }
 0x2ef   : > { %v3469_v18 = vpop.f32.mrf.mxu2 }
 0x2f0   : > { %v4761_v19 = vadd.f32 %v7277_v8, %v4721_v30  ;;  %v3553_v9 = vadd.f32 %v3469_v18, %v3092_v16 }
 0x2f1   : > { %v3010_v58 = vpop.f32.mrf.mxu1  ;;  %v4074_v7 = vpop.f32.mrf.mxu3 }
 0x2f2   : > { %v4797_v41 = vmax.f32 %v4761_v19, 0.0  ;;  %v4148_v57 = vadd.f32 %v4064_v59, %v3553_v9  ;;  %v3093_v4 = vadd.f32 %v3010_v58, %v7171_v11 }
 0x2f4   : > { %v4528_v23 = vpop.f32.mrf.mxu0  ;;  %v6263_v38 = vpack.c.bf16 %v4797_v41, %v4796_v10  ;;  %v4610_v29 = vadd.f32 %v4526_v36, %v4148_v57 }
 0x2f6   : > { %6297 = vst [vmem:[%s7307_s12 + $0x68] sm:$0xff] %v6263_v38   ;;  %v4722_v28 = vmul.f32 %v7267_v51, %v4610_v29 }
 0x2f7   : > { %v3471_v2 = vpop.f32.mrf.mxu2 }
 0x2f8   : > { %v3554_v60 = vadd.f32 %v3471_v2, %v3093_v4  ;;  %v4762_v43 = vadd.f32 %v7277_v8, %v4722_v28 }
 0x2f9   : > { %v3013_v48 = vpop.f32.mrf.mxu1  ;;  %v4076_v49 = vpop.f32.mrf.mxu3 }
 0x2fa   : > { %v4149_v61 = vadd.f32 %v4066_v42, %v3554_v60  ;;  %v3094_v0 = vadd.f32 %v3013_v48, %v7184_v20  ;;  %v4798_v26 = vmax.f32 %v4762_v43, 0.0  ;;  %v6342_v20 = vld [vmem:[%s7609_s2] ss:$0 sm:$0xff] }
 0x2fc   : > { %v4531_v54 = vpop.f32.mrf.mxu0  ;;  %v4611_v50 = vadd.f32 %v4528_v23, %v4149_v61 }
 0x2fe   : > { %v4723_v22 = vmul.f32 %v7267_v51, %v4611_v50 }
 0x2ff   : > { %v3474_v17 = vpop.f32.mrf.mxu2 }
 0x300   : > { %v4763_v21 = vadd.f32 %v7277_v8, %v4723_v22  ;;  %v3555_v11 = vadd.f32 %v3474_v17, %v3094_v0 }
 0x301   : > { %v3015_v25 = vpop.f32.mrf.mxu1  ;;  %v4079_v23 = vpop.f32.mrf.mxu3 }
 0x302   : > { %v4799_v46 = vmax.f32 %v4763_v21, 0.0  ;;  %v4150_v13 = vadd.f32 %v4069_v45, %v3555_v11  ;;  %v3095_v14 = vadd.f32 %v3015_v25, %v7195_v47 }
 0x304   : > { %v4533_v55 = vpop.f32.mrf.mxu0  ;;  %v6268_v40 = vpack.c.bf16 %v4799_v46, %v4798_v26  ;;  %v4612_v44 = vadd.f32 %v4531_v54, %v4150_v13 }
 0x306   : > { %6298 = vst [vmem:[%s7307_s12 + $0x70] sm:$0xff] %v6268_v40   ;;  %v4724_v8 = vmul.f32 %v6342_v20, %v4612_v44 }
 0x307   : > { %v3476_v1 = vpop.f32.mrf.mxu2 }
 0x308   : > { %v3556_v35 = vadd.f32 %v3476_v1, %v3095_v14  ;;  %v4764_v59 = vadd.f32 %v6343_v31, %v4724_v8 }
 0x309   : > { %v3018_v51 = vpop.f32.mrf.mxu1  ;;  %v4081_v22 = vpop.f32.mrf.mxu3 }
 0x30a   : > { %v4151_v53 = vadd.f32 %v4071_v32, %v3556_v35  ;;  %v3096_v47 = vadd.f32 %v3018_v51, %v7208_v5  ;;  %v4800_v12 = vmax.f32 %v4764_v59, 0.0 }
 0x30c   : > { %v4613_v34 = vadd.f32 %v4533_v55, %v4151_v53  ;;  %v4536_v15 = vpop.f32.mrf.mxu0 }
 0x30e   : > { %v4725_v39 = vmul.f32 %v6342_v20, %v4613_v34 }
 0x30f   : > { %v3479_v27 = vpop.f32.mrf.mxu2 }
 0x310   : > { %v4765_v63 = vadd.f32 %v6343_v31, %v4725_v39  ;;  %v3557_v3 = vadd.f32 %v3479_v27, %v3096_v47 }
 0x311   : > { %v3020_v24 = vpop.f32.mrf.mxu1 }
 0x312   : > { %v4801_v6 = vmax.f32 %v4765_v63, 0.0  ;;  %v4152_v56 = vadd.f32 %v4074_v7, %v3557_v3  ;;  %v3097_v37 = vadd.f32 %v3020_v24, %v7219_v62 }
 0x314   : > { %v6273_v36 = vpack.c.bf16 %v4801_v6, %v4800_v12  ;;  %v4614_v42 = vadd.f32 %v4536_v15, %v4152_v56  ;;  %v4538_v30 = vpop.f32.mrf.mxu0 }
 0x316   : > { %6299 = vst [vmem:[%s7307_s12 + $0x78] sm:$0xff] %v6273_v36   ;;  %v4726_v9 = vmul.f32 %v6342_v20, %v4614_v42 }
 0x317   : > { %v3481_v16 = vpop.f32.mrf.mxu2 }
 0x318   : > { %v3558_v18 = vadd.f32 %v3481_v16, %v3097_v37  ;;  %v4766_v10 = vadd.f32 %v6343_v31, %v4726_v9 }
 0x319   : > { %v3023_v19 = vpop.f32.mrf.mxu1 }
 0x31a   : > { %v4153_v5 = vadd.f32 %v4076_v49, %v3558_v18  ;;  %v3098_v57 = vadd.f32 %v3023_v19, %v7232_v33  ;;  %v4802_v45 = vmax.f32 %v4766_v10, 0.0 }
 0x31c   : > { %v4615_v58 = vadd.f32 %v4538_v30, %v4153_v5  ;;  %v4541_v2 = vpop.f32.mrf.mxu0 }
 0x31e   : > { %v4727_v41 = vmul.f32 %v6342_v20, %v4615_v58 }
 0x31f   : > { %v3484_v38 = vpop.f32.mrf.mxu2 }
 0x320   : > { %v4767_v29 = vadd.f32 %v6343_v31, %v4727_v41  ;;  %v3559_v4 = vadd.f32 %v3484_v38, %v3098_v57 }
 0x321   : > { %v3025_v48 = vpop.f32.mrf.mxu1 }
 0x322   : > { %v4803_v60 = vmax.f32 %v4767_v29, 0.0  ;;  %v4154_v62 = vadd.f32 %v4079_v23, %v3559_v4  ;;  %v3099_v54 = vadd.f32 %v3025_v48, %v7243_v52 }
 0x324   : > { %v6278_v28 = vpack.c.bf16 %v4803_v60, %v4802_v45  ;;  %v4616_v61 = vadd.f32 %v4541_v2, %v4154_v62  ;;  %v4543_v17 = vpop.f32.mrf.mxu0 }
 0x326   : > { %6300 = vst [vmem:[%s7307_s12 + $0x80] sm:$0xff] %v6278_v28   ;;  %v4728_v0 = vmul.f32 %v6342_v20, %v4616_v61 }
 0x327   : > { %v3486_v50 = vpop.f32.mrf.mxu2 }
 0x328   : > { %v3560_v43 = vadd.f32 %v3486_v50, %v3099_v54  ;;  %v4768_v11 = vadd.f32 %v6343_v31, %v4728_v0 }
 0x32a   : > { %v4155_v33 = vadd.f32 %v4081_v22, %v3560_v43  ;;  %v4804_v26 = vmax.f32 %v4768_v11, 0.0 }
 0x32c   : > { %v4617_v21 = vadd.f32 %v4543_v17, %v4155_v33 }
 0x32e   : > { %v4729_v25 = vmul.f32 %v6342_v20, %v4617_v21 }
 0x330   : > { %v4769_v32 = vadd.f32 %v6343_v31, %v4729_v25 }
 0x332   : > { %v4805_v46 = vmax.f32 %v4769_v32, 0.0 }
 0x334   : > { %v6283_v13 = vpack.c.bf16 %v4805_v46, %v4804_v26 }
 0x336   : > { %6301 = vst [vmem:[%s7307_s12 + $0x88] sm:$0xff] %v6283_v13  }
 0x337 PF: > { %s14_s17 = sadd.s32 1, %s6366_s17   ;;  %s7628_s15 = smov %s6362_s16 }
 0x338   : > { %p11_p5 = scmp.ge.s32.totalorder %s14_s17, 4   ;;  %s7629_s16 = smov %s7631_s18 }
 0x33a   :  { %13 = sbr.rel (!%p11_p5) target bundleno = 2 (0x2), region = 74 }

</bundles_post_ra>
